<compile_context>
chip_gen: v7x
topology: tpu7x:2x2x1
jax: 0.10.0
libtpu: 0.0.40
codegen_flags: <defaults>
</compile_context>

<pallas_src>
import jax
import jax.numpy as jnp
from jax.experimental import pallas as pl


# ----------------------------------------------------------------------------
# Fused forward kernel factory.
# Kernel args: A, X, (W_gcn, b_gcn) * n_gcn, W_ih, W_hh, b_lstm,
#              W1, b1, W2, b2  ->  outs, X_lstm
# NOTE: b_lstm is the sum of PyTorch's b_ih + b_hh (document for weight port).
# ----------------------------------------------------------------------------
def make_fused_kernel(T, N, n_gcn):
    def kernel(*refs):
        a_ref, x_ref = refs[0], refs[1]
        gcn_refs = [(refs[2 + 2 * i], refs[3 + 2 * i]) for i in range(n_gcn)]
        base = 2 + 2 * n_gcn
        wih_ref, whh_ref, bl_ref = refs[base], refs[base + 1], refs[base + 2]
        w1_ref, b1_ref, w2_ref, b2_ref = refs[base + 3:base + 7]
        outs_ref, xlstm_ref = refs[base + 7], refs[base + 8]

        A = a_ref[...]                       # (T, N, N)
        H3 = x_ref[...]                      # (T, N, F)

        # Block-constant mean-pooling matrix P: (T, T*N), P[t, t*N + n] = 1/N.
        # Lets the node-mean run as one MXU matmul fused into the GCN epilogue
        # (no 3-D cross-sublane reduce, no extra HBM round trip).
        row = jax.lax.broadcasted_iota(jnp.int32, (T, T * N), 0)
        col = jax.lax.broadcasted_iota(jnp.int32, (T, T * N), 1)
        in_block = (col >= row * N) & (col < (row + 1) * N)
        P = jnp.where(in_block, jnp.float32(1.0 / N), jnp.float32(0.0))

        pooled = None
        for li, (w_ref, b_ref) in enumerate(gcn_refs):
            # A_t @ H_t for all t at once (batched matmul on the MXU).
            ax = jnp.einsum('tnm,tmf->tnf', A, H3,
                            preferred_element_type=jnp.float32)
            fin = ax.shape[-1]
            hdim = w_ref.shape[1]
            # One big (T*N, fin) @ (fin, hdim) matmul for the weight projection.
            flat = jnp.dot(ax.reshape(T * N, fin), w_ref[...],
                           preferred_element_type=jnp.float32) + b_ref[...]
            flat = jnp.maximum(flat, 0.0)
            if li == n_gcn - 1:
                # Mean pooling over nodes fused here ('mean' key, no attention).
                pooled = jnp.dot(P, flat,
                                 preferred_element_type=jnp.float32)  # (T, hdim)
            else:
                H3 = flat.reshape(T, N, hdim)

        # ---- EventLSTM (single layer, unrolled; gate order i, f, g, o) ----
        Hh = whh_ref.shape[0]
        xg = jnp.dot(pooled, wih_ref[...],
                     preferred_element_type=jnp.float32) + bl_ref[...]  # (T, 4H)
        h = jnp.zeros((1, Hh), jnp.float32)
        c = jnp.zeros((1, Hh), jnp.float32)
        hs = []
        for t in range(T):                   # static unroll, static slices
            gates = xg[t:t + 1, :] + jnp.dot(
                h, whh_ref[...], preferred_element_type=jnp.float32)
            i_g = jax.nn.sigmoid(gates[:, 0:Hh])
            f_g = jax.nn.sigmoid(gates[:, Hh:2 * Hh])
            g_g = jnp.tanh(gates[:, 2 * Hh:3 * Hh])
            o_g = jax.nn.sigmoid(gates[:, 3 * Hh:4 * Hh])
            c = f_g * c + i_g * g_g
            h = o_g * jnp.tanh(c)
            hs.append(h)
        hs = jnp.concatenate(hs, axis=0)     # (T, Hh)
        xlstm_ref[...] = hs

        # ---- MLP classifier (epilogue on data already in vregs) ----
        m = jnp.maximum(
            jnp.dot(hs, w1_ref[...], preferred_element_type=jnp.float32)
            + b1_ref[...], 0.0)
        outs_ref[...] = (jnp.dot(m, w2_ref[...],
                                 preferred_element_type=jnp.float32)
                         + b2_ref[...])

    return kernel


# ----------------------------------------------------------------------------
# Full DyGED_NA forward (single pallas_call; everything stays in VMEM).
# ----------------------------------------------------------------------------
def dyged_na_forward(X, A, params):
    T, N, _ = X.shape
    gcn_params = params["gcn"]
    H_lstm = params["lstm"][1].shape[0]
    n_out = params["mlp"][2].shape[1]

    flat_inputs = [A, X]
    for (W, b) in gcn_params:
        flat_inputs += [W, b]
    flat_inputs += list(params["lstm"])
    flat_inputs += list(params["mlp"])

    kernel = make_fused_kernel(T, N, len(gcn_params))
    outs, X_lstm = pl.pallas_call(
        kernel,
        out_shape=(jax.ShapeDtypeStruct((T, n_out), jnp.float32),
                   jax.ShapeDtypeStruct((T, H_lstm), jnp.float32)),
    )(*flat_inputs)
    S_node = None                             # NA variant: mean pooling only
    return outs, X_lstm, S_node, None


# ----------------------------------------------------------------------------
# Pure-JAX reference (for correctness check)
# ----------------------------------------------------------------------------
def dyged_na_reference(X, A, params):
    H = X
    for (W, b) in params["gcn"]:
        H = jnp.maximum(jnp.einsum('tnm,tmf->tnf', A, H) @ W + b, 0.0)
    pooled = jnp.mean(H, axis=1)                                   # (T, Hgcn)
    W_ih, W_hh, b_l = params["lstm"]
    Hh = W_hh.shape[0]
    xg = pooled @ W_ih + b_l
    h = jnp.zeros((1, Hh), jnp.float32)
    c = jnp.zeros((1, Hh), jnp.float32)
    hs = []
    for t in range(X.shape[0]):
        gates = xg[t:t + 1] + h @ W_hh
        i = jax.nn.sigmoid(gates[:, 0:Hh])
        f = jax.nn.sigmoid(gates[:, Hh:2 * Hh])
        g = jnp.tanh(gates[:, 2 * Hh:3 * Hh])
        o = jax.nn.sigmoid(gates[:, 3 * Hh:4 * Hh])
        c = f * c + i * g
        h = o * jnp.tanh(c)
        hs.append(h)
    hs = jnp.concatenate(hs, axis=0)
    W1, b1, W2, b2 = params["mlp"]
    m = jnp.maximum(hs @ W1 + b1, 0.0)
    return m @ W2 + b2, hs


def init_params(key, n_feature, n_hidden_gcn, n_hidden_lstm, n_hidden_mlp, n_output):
    keys = iter(jax.random.split(key, 32))
    params = {"gcn": []}
    fin = n_feature
    for h in n_hidden_gcn:
        W = 0.1 * jax.random.normal(next(keys), (fin, h), jnp.float32)
        b = 0.1 * jax.random.normal(next(keys), (1, h), jnp.float32)
        params["gcn"].append((W, b))
        fin = h
    H_in, H = n_hidden_gcn[-1], n_hidden_lstm
    W_ih = 0.1 * jax.random.normal(next(keys), (H_in, 4 * H), jnp.float32)
    W_hh = 0.1 * jax.random.normal(next(keys), (H, 4 * H), jnp.float32)
    b_lstm = 0.1 * jax.random.normal(next(keys), (1, 4 * H), jnp.float32)
    params["lstm"] = (W_ih, W_hh, b_lstm)   # b_lstm = b_ih + b_hh when porting
    W1 = 0.1 * jax.random.normal(next(keys), (H, n_hidden_mlp), jnp.float32)
    b1 = 0.1 * jax.random.normal(next(keys), (1, n_hidden_mlp), jnp.float32)
    W2 = 0.1 * jax.random.normal(next(keys), (n_hidden_mlp, n_output), jnp.float32)
    b2 = 0.1 * jax.random.normal(next(keys), (1, n_output), jnp.float32)
    params["mlp"] = (W1, b1, W2, b2)
    return params


if __name__ == "__main__":
    key = jax.random.PRNGKey(0)
    k_x, k_a, k_p = jax.random.split(key, 3)

    # Small config consistent with the module's constructor args.
    T, N, F = 8, 8, 8                       # time-steps, adj_size, n_feature
    n_hidden_gcn = [16, 32]
    n_hidden_lstm = 32
    n_hidden_mlp = 16
    n_output = 2

    X = jax.random.normal(k_x, (T, N, F), jnp.float32)

    # Deterministic symmetric adjacency with self-loops, row-normalized (glue).
    raw = jax.random.uniform(k_a, (T, N, N))
    adj = ((raw + jnp.transpose(raw, (0, 2, 1))) > 1.0).astype(jnp.float32)
    adj = adj + jnp.eye(N, dtype=jnp.float32)[None]
    A = adj / jnp.sum(adj, axis=-1, keepdims=True)

    params = init_params(k_p, F, n_hidden_gcn, n_hidden_lstm, n_hidden_mlp, n_output)

    outs, X_emb, S_node, _ = dyged_na_forward(X, A, params)
    jax.block_until_ready(outs)
    jax.block_until_ready(X_emb)
    assert outs.shape == (T, n_output) and X_emb.shape == (T, n_hidden_lstm)

    # Correctness check against a pure-JAX reference (loose fp32/MXU tolerance).
    ref_outs, ref_emb = dyged_na_reference(X, A, params)
    assert jnp.allclose(outs, ref_outs, rtol=2e-2, atol=2e-2)
    assert jnp.allclose(X_emb, ref_emb, rtol=2e-2, atol=2e-2)

    print("KERNEL_OK")
</pallas_src>

<mosaic_0001>
module attributes {stable_mosaic.version = 11 : i64} {
  func.func @kernel(%arg0: memref<8x8x8xf32, #tpu.memory_space<vmem>>, %arg1: memref<8x8x8xf32, #tpu.memory_space<vmem>>, %arg2: memref<8x16xf32, #tpu.memory_space<vmem>>, %arg3: memref<1x16xf32, #tpu.memory_space<vmem>>, %arg4: memref<16x32xf32, #tpu.memory_space<vmem>>, %arg5: memref<1x32xf32, #tpu.memory_space<vmem>>, %arg6: memref<32x128xf32, #tpu.memory_space<vmem>>, %arg7: memref<32x128xf32, #tpu.memory_space<vmem>>, %arg8: memref<1x128xf32, #tpu.memory_space<vmem>>, %arg9: memref<32x16xf32, #tpu.memory_space<vmem>>, %arg10: memref<1x16xf32, #tpu.memory_space<vmem>>, %arg11: memref<16x2xf32, #tpu.memory_space<vmem>>, %arg12: memref<1x2xf32, #tpu.memory_space<vmem>>, %arg13: memref<8x2xf32, #tpu.memory_space<vmem>>, %arg14: memref<8x32xf32, #tpu.memory_space<vmem>>) attributes {dimension_semantics = [], scalar_prefetch = 0 : i64, scratch_operands = 0 : i64, tpu.core_type = #tpu.core_type<tc>} {
    %c0 = arith.constant 0 : index
    %c0_0 = arith.constant 0 : index
    %c0_1 = arith.constant 0 : index
    %0 = vector.load %arg0[%c0, %c0_0, %c0_1] : memref<8x8x8xf32, #tpu.memory_space<vmem>>, vector<8x8x8xf32>
    %c0_2 = arith.constant 0 : index
    %c0_3 = arith.constant 0 : index
    %c0_4 = arith.constant 0 : index
    %1 = vector.load %arg1[%c0_2, %c0_3, %c0_4] : memref<8x8x8xf32, #tpu.memory_space<vmem>>, vector<8x8x8xf32>
    %2 = tpu.iota {dimensions = array<i32: 0>} : vector<8x64xi32>
    %3 = tpu.iota {dimensions = array<i32: 1>} : vector<8x64xi32>
    %c8_i32 = arith.constant 8 : i32
    %4 = vector.broadcast %c8_i32 : i32 to vector<8x64xi32>
    %5 = arith.muli %2, %4 : vector<8x64xi32>
    %6 = arith.cmpi sge, %3, %5 : vector<8x64xi32>
    %c1_i32 = arith.constant 1 : i32
    %7 = vector.broadcast %c1_i32 : i32 to vector<8x64xi32>
    %8 = arith.addi %2, %7 : vector<8x64xi32>
    %c8_i32_5 = arith.constant 8 : i32
    %9 = vector.broadcast %c8_i32_5 : i32 to vector<8x64xi32>
    %10 = arith.muli %8, %9 : vector<8x64xi32>
    %11 = arith.cmpi slt, %3, %10 : vector<8x64xi32>
    %12 = arith.andi %6, %11 : vector<8x64xi1>
    %cst = arith.constant 1.250000e-01 : f32
    %cst_6 = arith.constant 0.000000e+00 : f32
    %13 = vector.broadcast %cst : f32 to vector<8x64xf32>
    %14 = vector.broadcast %cst_6 : f32 to vector<8x64xf32>
    %15 = arith.select %12, %13, %14 : vector<8x64xi1>, vector<8x64xf32>
    "tpu.trace_start"() <{level = 10 : i32, message = "tnm,tmf->tnf"}> : () -> ()
    %cst_7 = arith.constant dense<0.000000e+00> : vector<8x8x8xf32>
    %16 = tpu.matmul %0, %1, %cst_7 {dimension_numbers = #tpu.dot_dimension_numbers<[2], [1], [1], [2], [0, 0, 0, 1, 1, 2], [0], [0]>} : vector<8x8x8xf32>, vector<8x8x8xf32>, vector<8x8x8xf32> -> vector<8x8x8xf32>
    "tpu.trace_stop"() : () -> ()
    %17 = vector.shape_cast %16 : vector<8x8x8xf32> to vector<64x8xf32>
    %c0_8 = arith.constant 0 : index
    %c0_9 = arith.constant 0 : index
    %18 = vector.load %arg2[%c0_8, %c0_9] : memref<8x16xf32, #tpu.memory_space<vmem>>, vector<8x16xf32>
    %cst_10 = arith.constant dense<0.000000e+00> : vector<64x16xf32>
    %19 = tpu.matmul %17, %18, %cst_10 {dimension_numbers = #tpu.dot_dimension_numbers<[1], [0], [0], [1], [0, 0, 1, 1], [], []>} : vector<64x8xf32>, vector<8x16xf32>, vector<64x16xf32> -> vector<64x16xf32>
    %c0_11 = arith.constant 0 : index
    %c0_12 = arith.constant 0 : index
    %20 = vector.load %arg3[%c0_11, %c0_12] : memref<1x16xf32, #tpu.memory_space<vmem>>, vector<1x16xf32>
    %21 = vector.broadcast %20 : vector<1x16xf32> to vector<64x16xf32>
    %22 = arith.addf %19, %21 : vector<64x16xf32>
    %cst_13 = arith.constant 0.000000e+00 : f32
    %23 = vector.broadcast %cst_13 : f32 to vector<64x16xf32>
    %24 = arith.maximumf %22, %23 : vector<64x16xf32>
    %25 = vector.shape_cast %24 : vector<64x16xf32> to vector<8x8x16xf32>
    "tpu.trace_start"() <{level = 10 : i32, message = "tnm,tmf->tnf"}> : () -> ()
    %cst_14 = arith.constant dense<0.000000e+00> : vector<8x8x16xf32>
    %26 = tpu.matmul %0, %25, %cst_14 {dimension_numbers = #tpu.dot_dimension_numbers<[2], [1], [1], [2], [0, 0, 0, 1, 1, 2], [0], [0]>} : vector<8x8x8xf32>, vector<8x8x16xf32>, vector<8x8x16xf32> -> vector<8x8x16xf32>
    "tpu.trace_stop"() : () -> ()
    %27 = vector.shape_cast %26 : vector<8x8x16xf32> to vector<64x16xf32>
    %c0_15 = arith.constant 0 : index
    %c0_16 = arith.constant 0 : index
    %28 = vector.load %arg4[%c0_15, %c0_16] : memref<16x32xf32, #tpu.memory_space<vmem>>, vector<16x32xf32>
    %cst_17 = arith.constant dense<0.000000e+00> : vector<64x32xf32>
    %29 = tpu.matmul %27, %28, %cst_17 {dimension_numbers = #tpu.dot_dimension_numbers<[1], [0], [0], [1], [0, 0, 1, 1], [], []>} : vector<64x16xf32>, vector<16x32xf32>, vector<64x32xf32> -> vector<64x32xf32>
    %c0_18 = arith.constant 0 : index
    %c0_19 = arith.constant 0 : index
    %30 = vector.load %arg5[%c0_18, %c0_19] : memref<1x32xf32, #tpu.memory_space<vmem>>, vector<1x32xf32>
    %31 = vector.broadcast %30 : vector<1x32xf32> to vector<64x32xf32>
    %32 = arith.addf %29, %31 : vector<64x32xf32>
    %cst_20 = arith.constant 0.000000e+00 : f32
    %33 = vector.broadcast %cst_20 : f32 to vector<64x32xf32>
    %34 = arith.maximumf %32, %33 : vector<64x32xf32>
    %cst_21 = arith.constant dense<0.000000e+00> : vector<8x32xf32>
    %35 = tpu.matmul %15, %34, %cst_21 {dimension_numbers = #tpu.dot_dimension_numbers<[1], [0], [0], [1], [0, 0, 1, 1], [], []>} : vector<8x64xf32>, vector<64x32xf32>, vector<8x32xf32> -> vector<8x32xf32>
    %c0_22 = arith.constant 0 : index
    %c0_23 = arith.constant 0 : index
    %36 = vector.load %arg6[%c0_22, %c0_23] : memref<32x128xf32, #tpu.memory_space<vmem>>, vector<32x128xf32>
    %cst_24 = arith.constant dense<0.000000e+00> : vector<8x128xf32>
    %37 = tpu.matmul %35, %36, %cst_24 {dimension_numbers = #tpu.dot_dimension_numbers<[1], [0], [0], [1], [0, 0, 1, 1], [], []>} : vector<8x32xf32>, vector<32x128xf32>, vector<8x128xf32> -> vector<8x128xf32>
    %c0_25 = arith.constant 0 : index
    %c0_26 = arith.constant 0 : index
    %38 = vector.load %arg8[%c0_25, %c0_26] : memref<1x128xf32, #tpu.memory_space<vmem>>, vector<1x128xf32>
    %39 = vector.broadcast %38 : vector<1x128xf32> to vector<8x128xf32>
    %40 = arith.addf %37, %39 : vector<8x128xf32>
    %cst_27 = arith.constant 0.000000e+00 : f32
    %41 = vector.broadcast %cst_27 : f32 to vector<1x32xf32>
    %cst_28 = arith.constant 0.000000e+00 : f32
    %42 = vector.broadcast %cst_28 : f32 to vector<1x32xf32>
    %43 = vector.extract_strided_slice %40 {offsets = [0, 0], sizes = [1, 128], strides = [1, 1]} : vector<8x128xf32> to vector<1x128xf32>
    %c0_29 = arith.constant 0 : index
    %c0_30 = arith.constant 0 : index
    %44 = vector.load %arg7[%c0_29, %c0_30] : memref<32x128xf32, #tpu.memory_space<vmem>>, vector<32x128xf32>
    %cst_31 = arith.constant dense<0.000000e+00> : vector<1x128xf32>
    %45 = tpu.matmul %41, %44, %cst_31 {dimension_numbers = #tpu.dot_dimension_numbers<[1], [0], [0], [1], [0, 0, 1, 1], [], []>} : vector<1x32xf32>, vector<32x128xf32>, vector<1x128xf32> -> vector<1x128xf32>
    %46 = arith.addf %43, %45 : vector<1x128xf32>
    %47 = vector.extract_strided_slice %46 {offsets = [0, 0], sizes = [1, 32], strides = [1, 1]} : vector<1x128xf32> to vector<1x32xf32>
    %48 = arith.negf %47 : vector<1x32xf32>
    %49 = math.exp %48 : vector<1x32xf32>
    %cst_32 = arith.constant 1.000000e+00 : f32
    %50 = vector.broadcast %cst_32 : f32 to vector<1x32xf32>
    %51 = arith.addf %50, %49 : vector<1x32xf32>
    %52 = arith.divf %50, %51 : vector<1x32xf32>
    %53 = vector.extract_strided_slice %46 {offsets = [0, 32], sizes = [1, 32], strides = [1, 1]} : vector<1x128xf32> to vector<1x32xf32>
    %54 = arith.negf %53 : vector<1x32xf32>
    %55 = math.exp %54 : vector<1x32xf32>
    %cst_33 = arith.constant 1.000000e+00 : f32
    %56 = vector.broadcast %cst_33 : f32 to vector<1x32xf32>
    %57 = arith.addf %56, %55 : vector<1x32xf32>
    %58 = arith.divf %56, %57 : vector<1x32xf32>
    %59 = vector.extract_strided_slice %46 {offsets = [0, 64], sizes = [1, 32], strides = [1, 1]} : vector<1x128xf32> to vector<1x32xf32>
    %60 = math.tanh %59 : vector<1x32xf32>
    %61 = vector.extract_strided_slice %46 {offsets = [0, 96], sizes = [1, 32], strides = [1, 1]} : vector<1x128xf32> to vector<1x32xf32>
    %62 = arith.negf %61 : vector<1x32xf32>
    %63 = math.exp %62 : vector<1x32xf32>
    %cst_34 = arith.constant 1.000000e+00 : f32
    %64 = vector.broadcast %cst_34 : f32 to vector<1x32xf32>
    %65 = arith.addf %64, %63 : vector<1x32xf32>
    %66 = arith.divf %64, %65 : vector<1x32xf32>
    %67 = arith.mulf %58, %42 : vector<1x32xf32>
    %68 = arith.mulf %52, %60 : vector<1x32xf32>
    %69 = arith.addf %67, %68 : vector<1x32xf32>
    %70 = math.tanh %69 : vector<1x32xf32>
    %71 = arith.mulf %66, %70 : vector<1x32xf32>
    %72 = vector.extract_strided_slice %40 {offsets = [1, 0], sizes = [1, 128], strides = [1, 1]} : vector<8x128xf32> to vector<1x128xf32>
    %c0_35 = arith.constant 0 : index
    %c0_36 = arith.constant 0 : index
    %73 = vector.load %arg7[%c0_35, %c0_36] : memref<32x128xf32, #tpu.memory_space<vmem>>, vector<32x128xf32>
    %cst_37 = arith.constant dense<0.000000e+00> : vector<1x128xf32>
    %74 = tpu.matmul %71, %73, %cst_37 {dimension_numbers = #tpu.dot_dimension_numbers<[1], [0], [0], [1], [0, 0, 1, 1], [], []>} : vector<1x32xf32>, vector<32x128xf32>, vector<1x128xf32> -> vector<1x128xf32>
    %75 = arith.addf %72, %74 : vector<1x128xf32>
    %76 = vector.extract_strided_slice %75 {offsets = [0, 0], sizes = [1, 32], strides = [1, 1]} : vector<1x128xf32> to vector<1x32xf32>
    %77 = arith.negf %76 : vector<1x32xf32>
    %78 = math.exp %77 : vector<1x32xf32>
    %cst_38 = arith.constant 1.000000e+00 : f32
    %79 = vector.broadcast %cst_38 : f32 to vector<1x32xf32>
    %80 = arith.addf %79, %78 : vector<1x32xf32>
    %81 = arith.divf %79, %80 : vector<1x32xf32>
    %82 = vector.extract_strided_slice %75 {offsets = [0, 32], sizes = [1, 32], strides = [1, 1]} : vector<1x128xf32> to vector<1x32xf32>
    %83 = arith.negf %82 : vector<1x32xf32>
    %84 = math.exp %83 : vector<1x32xf32>
    %cst_39 = arith.constant 1.000000e+00 : f32
    %85 = vector.broadcast %cst_39 : f32 to vector<1x32xf32>
    %86 = arith.addf %85, %84 : vector<1x32xf32>
    %87 = arith.divf %85, %86 : vector<1x32xf32>
    %88 = vector.extract_strided_slice %75 {offsets = [0, 64], sizes = [1, 32], strides = [1, 1]} : vector<1x128xf32> to vector<1x32xf32>
    %89 = math.tanh %88 : vector<1x32xf32>
    %90 = vector.extract_strided_slice %75 {offsets = [0, 96], sizes = [1, 32], strides = [1, 1]} : vector<1x128xf32> to vector<1x32xf32>
    %91 = arith.negf %90 : vector<1x32xf32>
    %92 = math.exp %91 : vector<1x32xf32>
    %cst_40 = arith.constant 1.000000e+00 : f32
    %93 = vector.broadcast %cst_40 : f32 to vector<1x32xf32>
    %94 = arith.addf %93, %92 : vector<1x32xf32>
    %95 = arith.divf %93, %94 : vector<1x32xf32>
    %96 = arith.mulf %87, %69 : vector<1x32xf32>
    %97 = arith.mulf %81, %89 : vector<1x32xf32>
    %98 = arith.addf %96, %97 : vector<1x32xf32>
    %99 = math.tanh %98 : vector<1x32xf32>
    %100 = arith.mulf %95, %99 : vector<1x32xf32>
    %101 = vector.extract_strided_slice %40 {offsets = [2, 0], sizes = [1, 128], strides = [1, 1]} : vector<8x128xf32> to vector<1x128xf32>
    %c0_41 = arith.constant 0 : index
    %c0_42 = arith.constant 0 : index
    %102 = vector.load %arg7[%c0_41, %c0_42] : memref<32x128xf32, #tpu.memory_space<vmem>>, vector<32x128xf32>
    %cst_43 = arith.constant dense<0.000000e+00> : vector<1x128xf32>
    %103 = tpu.matmul %100, %102, %cst_43 {dimension_numbers = #tpu.dot_dimension_numbers<[1], [0], [0], [1], [0, 0, 1, 1], [], []>} : vector<1x32xf32>, vector<32x128xf32>, vector<1x128xf32> -> vector<1x128xf32>
    %104 = arith.addf %101, %103 : vector<1x128xf32>
    %105 = vector.extract_strided_slice %104 {offsets = [0, 0], sizes = [1, 32], strides = [1, 1]} : vector<1x128xf32> to vector<1x32xf32>
    %106 = arith.negf %105 : vector<1x32xf32>
    %107 = math.exp %106 : vector<1x32xf32>
    %cst_44 = arith.constant 1.000000e+00 : f32
    %108 = vector.broadcast %cst_44 : f32 to vector<1x32xf32>
    %109 = arith.addf %108, %107 : vector<1x32xf32>
    %110 = arith.divf %108, %109 : vector<1x32xf32>
    %111 = vector.extract_strided_slice %104 {offsets = [0, 32], sizes = [1, 32], strides = [1, 1]} : vector<1x128xf32> to vector<1x32xf32>
    %112 = arith.negf %111 : vector<1x32xf32>
    %113 = math.exp %112 : vector<1x32xf32>
    %cst_45 = arith.constant 1.000000e+00 : f32
    %114 = vector.broadcast %cst_45 : f32 to vector<1x32xf32>
    %115 = arith.addf %114, %113 : vector<1x32xf32>
    %116 = arith.divf %114, %115 : vector<1x32xf32>
    %117 = vector.extract_strided_slice %104 {offsets = [0, 64], sizes = [1, 32], strides = [1, 1]} : vector<1x128xf32> to vector<1x32xf32>
    %118 = math.tanh %117 : vector<1x32xf32>
    %119 = vector.extract_strided_slice %104 {offsets = [0, 96], sizes = [1, 32], strides = [1, 1]} : vector<1x128xf32> to vector<1x32xf32>
    %120 = arith.negf %119 : vector<1x32xf32>
    %121 = math.exp %120 : vector<1x32xf32>
    %cst_46 = arith.constant 1.000000e+00 : f32
    %122 = vector.broadcast %cst_46 : f32 to vector<1x32xf32>
    %123 = arith.addf %122, %121 : vector<1x32xf32>
    %124 = arith.divf %122, %123 : vector<1x32xf32>
    %125 = arith.mulf %116, %98 : vector<1x32xf32>
    %126 = arith.mulf %110, %118 : vector<1x32xf32>
    %127 = arith.addf %125, %126 : vector<1x32xf32>
    %128 = math.tanh %127 : vector<1x32xf32>
    %129 = arith.mulf %124, %128 : vector<1x32xf32>
    %130 = vector.extract_strided_slice %40 {offsets = [3, 0], sizes = [1, 128], strides = [1, 1]} : vector<8x128xf32> to vector<1x128xf32>
    %c0_47 = arith.constant 0 : index
    %c0_48 = arith.constant 0 : index
    %131 = vector.load %arg7[%c0_47, %c0_48] : memref<32x128xf32, #tpu.memory_space<vmem>>, vector<32x128xf32>
    %cst_49 = arith.constant dense<0.000000e+00> : vector<1x128xf32>
    %132 = tpu.matmul %129, %131, %cst_49 {dimension_numbers = #tpu.dot_dimension_numbers<[1], [0], [0], [1], [0, 0, 1, 1], [], []>} : vector<1x32xf32>, vector<32x128xf32>, vector<1x128xf32> -> vector<1x128xf32>
    %133 = arith.addf %130, %132 : vector<1x128xf32>
    %134 = vector.extract_strided_slice %133 {offsets = [0, 0], sizes = [1, 32], strides = [1, 1]} : vector<1x128xf32> to vector<1x32xf32>
    %135 = arith.negf %134 : vector<1x32xf32>
    %136 = math.exp %135 : vector<1x32xf32>
    %cst_50 = arith.constant 1.000000e+00 : f32
    %137 = vector.broadcast %cst_50 : f32 to vector<1x32xf32>
    %138 = arith.addf %137, %136 : vector<1x32xf32>
    %139 = arith.divf %137, %138 : vector<1x32xf32>
    %140 = vector.extract_strided_slice %133 {offsets = [0, 32], sizes = [1, 32], strides = [1, 1]} : vector<1x128xf32> to vector<1x32xf32>
    %141 = arith.negf %140 : vector<1x32xf32>
    %142 = math.exp %141 : vector<1x32xf32>
    %cst_51 = arith.constant 1.000000e+00 : f32
    %143 = vector.broadcast %cst_51 : f32 to vector<1x32xf32>
    %144 = arith.addf %143, %142 : vector<1x32xf32>
    %145 = arith.divf %143, %144 : vector<1x32xf32>
    %146 = vector.extract_strided_slice %133 {offsets = [0, 64], sizes = [1, 32], strides = [1, 1]} : vector<1x128xf32> to vector<1x32xf32>
    %147 = math.tanh %146 : vector<1x32xf32>
    %148 = vector.extract_strided_slice %133 {offsets = [0, 96], sizes = [1, 32], strides = [1, 1]} : vector<1x128xf32> to vector<1x32xf32>
    %149 = arith.negf %148 : vector<1x32xf32>
    %150 = math.exp %149 : vector<1x32xf32>
    %cst_52 = arith.constant 1.000000e+00 : f32
    %151 = vector.broadcast %cst_52 : f32 to vector<1x32xf32>
    %152 = arith.addf %151, %150 : vector<1x32xf32>
    %153 = arith.divf %151, %152 : vector<1x32xf32>
    %154 = arith.mulf %145, %127 : vector<1x32xf32>
    %155 = arith.mulf %139, %147 : vector<1x32xf32>
    %156 = arith.addf %154, %155 : vector<1x32xf32>
    %157 = math.tanh %156 : vector<1x32xf32>
    %158 = arith.mulf %153, %157 : vector<1x32xf32>
    %159 = vector.extract_strided_slice %40 {offsets = [4, 0], sizes = [1, 128], strides = [1, 1]} : vector<8x128xf32> to vector<1x128xf32>
    %c0_53 = arith.constant 0 : index
    %c0_54 = arith.constant 0 : index
    %160 = vector.load %arg7[%c0_53, %c0_54] : memref<32x128xf32, #tpu.memory_space<vmem>>, vector<32x128xf32>
    %cst_55 = arith.constant dense<0.000000e+00> : vector<1x128xf32>
    %161 = tpu.matmul %158, %160, %cst_55 {dimension_numbers = #tpu.dot_dimension_numbers<[1], [0], [0], [1], [0, 0, 1, 1], [], []>} : vector<1x32xf32>, vector<32x128xf32>, vector<1x128xf32> -> vector<1x128xf32>
    %162 = arith.addf %159, %161 : vector<1x128xf32>
    %163 = vector.extract_strided_slice %162 {offsets = [0, 0], sizes = [1, 32], strides = [1, 1]} : vector<1x128xf32> to vector<1x32xf32>
    %164 = arith.negf %163 : vector<1x32xf32>
    %165 = math.exp %164 : vector<1x32xf32>
    %cst_56 = arith.constant 1.000000e+00 : f32
    %166 = vector.broadcast %cst_56 : f32 to vector<1x32xf32>
    %167 = arith.addf %166, %165 : vector<1x32xf32>
    %168 = arith.divf %166, %167 : vector<1x32xf32>
    %169 = vector.extract_strided_slice %162 {offsets = [0, 32], sizes = [1, 32], strides = [1, 1]} : vector<1x128xf32> to vector<1x32xf32>
    %170 = arith.negf %169 : vector<1x32xf32>
    %171 = math.exp %170 : vector<1x32xf32>
    %cst_57 = arith.constant 1.000000e+00 : f32
    %172 = vector.broadcast %cst_57 : f32 to vector<1x32xf32>
    %173 = arith.addf %172, %171 : vector<1x32xf32>
    %174 = arith.divf %172, %173 : vector<1x32xf32>
    %175 = vector.extract_strided_slice %162 {offsets = [0, 64], sizes = [1, 32], strides = [1, 1]} : vector<1x128xf32> to vector<1x32xf32>
    %176 = math.tanh %175 : vector<1x32xf32>
    %177 = vector.extract_strided_slice %162 {offsets = [0, 96], sizes = [1, 32], strides = [1, 1]} : vector<1x128xf32> to vector<1x32xf32>
    %178 = arith.negf %177 : vector<1x32xf32>
    %179 = math.exp %178 : vector<1x32xf32>
    %cst_58 = arith.constant 1.000000e+00 : f32
    %180 = vector.broadcast %cst_58 : f32 to vector<1x32xf32>
    %181 = arith.addf %180, %179 : vector<1x32xf32>
    %182 = arith.divf %180, %181 : vector<1x32xf32>
    %183 = arith.mulf %174, %156 : vector<1x32xf32>
    %184 = arith.mulf %168, %176 : vector<1x32xf32>
    %185 = arith.addf %183, %184 : vector<1x32xf32>
    %186 = math.tanh %185 : vector<1x32xf32>
    %187 = arith.mulf %182, %186 : vector<1x32xf32>
    %188 = vector.extract_strided_slice %40 {offsets = [5, 0], sizes = [1, 128], strides = [1, 1]} : vector<8x128xf32> to vector<1x128xf32>
    %c0_59 = arith.constant 0 : index
    %c0_60 = arith.constant 0 : index
    %189 = vector.load %arg7[%c0_59, %c0_60] : memref<32x128xf32, #tpu.memory_space<vmem>>, vector<32x128xf32>
    %cst_61 = arith.constant dense<0.000000e+00> : vector<1x128xf32>
    %190 = tpu.matmul %187, %189, %cst_61 {dimension_numbers = #tpu.dot_dimension_numbers<[1], [0], [0], [1], [0, 0, 1, 1], [], []>} : vector<1x32xf32>, vector<32x128xf32>, vector<1x128xf32> -> vector<1x128xf32>
    %191 = arith.addf %188, %190 : vector<1x128xf32>
    %192 = vector.extract_strided_slice %191 {offsets = [0, 0], sizes = [1, 32], strides = [1, 1]} : vector<1x128xf32> to vector<1x32xf32>
    %193 = arith.negf %192 : vector<1x32xf32>
    %194 = math.exp %193 : vector<1x32xf32>
    %cst_62 = arith.constant 1.000000e+00 : f32
    %195 = vector.broadcast %cst_62 : f32 to vector<1x32xf32>
    %196 = arith.addf %195, %194 : vector<1x32xf32>
    %197 = arith.divf %195, %196 : vector<1x32xf32>
    %198 = vector.extract_strided_slice %191 {offsets = [0, 32], sizes = [1, 32], strides = [1, 1]} : vector<1x128xf32> to vector<1x32xf32>
    %199 = arith.negf %198 : vector<1x32xf32>
    %200 = math.exp %199 : vector<1x32xf32>
    %cst_63 = arith.constant 1.000000e+00 : f32
    %201 = vector.broadcast %cst_63 : f32 to vector<1x32xf32>
    %202 = arith.addf %201, %200 : vector<1x32xf32>
    %203 = arith.divf %201, %202 : vector<1x32xf32>
    %204 = vector.extract_strided_slice %191 {offsets = [0, 64], sizes = [1, 32], strides = [1, 1]} : vector<1x128xf32> to vector<1x32xf32>
    %205 = math.tanh %204 : vector<1x32xf32>
    %206 = vector.extract_strided_slice %191 {offsets = [0, 96], sizes = [1, 32], strides = [1, 1]} : vector<1x128xf32> to vector<1x32xf32>
    %207 = arith.negf %206 : vector<1x32xf32>
    %208 = math.exp %207 : vector<1x32xf32>
    %cst_64 = arith.constant 1.000000e+00 : f32
    %209 = vector.broadcast %cst_64 : f32 to vector<1x32xf32>
    %210 = arith.addf %209, %208 : vector<1x32xf32>
    %211 = arith.divf %209, %210 : vector<1x32xf32>
    %212 = arith.mulf %203, %185 : vector<1x32xf32>
    %213 = arith.mulf %197, %205 : vector<1x32xf32>
    %214 = arith.addf %212, %213 : vector<1x32xf32>
    %215 = math.tanh %214 : vector<1x32xf32>
    %216 = arith.mulf %211, %215 : vector<1x32xf32>
    %217 = vector.extract_strided_slice %40 {offsets = [6, 0], sizes = [1, 128], strides = [1, 1]} : vector<8x128xf32> to vector<1x128xf32>
    %c0_65 = arith.constant 0 : index
    %c0_66 = arith.constant 0 : index
    %218 = vector.load %arg7[%c0_65, %c0_66] : memref<32x128xf32, #tpu.memory_space<vmem>>, vector<32x128xf32>
    %cst_67 = arith.constant dense<0.000000e+00> : vector<1x128xf32>
    %219 = tpu.matmul %216, %218, %cst_67 {dimension_numbers = #tpu.dot_dimension_numbers<[1], [0], [0], [1], [0, 0, 1, 1], [], []>} : vector<1x32xf32>, vector<32x128xf32>, vector<1x128xf32> -> vector<1x128xf32>
    %220 = arith.addf %217, %219 : vector<1x128xf32>
    %221 = vector.extract_strided_slice %220 {offsets = [0, 0], sizes = [1, 32], strides = [1, 1]} : vector<1x128xf32> to vector<1x32xf32>
    %222 = arith.negf %221 : vector<1x32xf32>
    %223 = math.exp %222 : vector<1x32xf32>
    %cst_68 = arith.constant 1.000000e+00 : f32
    %224 = vector.broadcast %cst_68 : f32 to vector<1x32xf32>
    %225 = arith.addf %224, %223 : vector<1x32xf32>
    %226 = arith.divf %224, %225 : vector<1x32xf32>
    %227 = vector.extract_strided_slice %220 {offsets = [0, 32], sizes = [1, 32], strides = [1, 1]} : vector<1x128xf32> to vector<1x32xf32>
    %228 = arith.negf %227 : vector<1x32xf32>
    %229 = math.exp %228 : vector<1x32xf32>
    %cst_69 = arith.constant 1.000000e+00 : f32
    %230 = vector.broadcast %cst_69 : f32 to vector<1x32xf32>
    %231 = arith.addf %230, %229 : vector<1x32xf32>
    %232 = arith.divf %230, %231 : vector<1x32xf32>
    %233 = vector.extract_strided_slice %220 {offsets = [0, 64], sizes = [1, 32], strides = [1, 1]} : vector<1x128xf32> to vector<1x32xf32>
    %234 = math.tanh %233 : vector<1x32xf32>
    %235 = vector.extract_strided_slice %220 {offsets = [0, 96], sizes = [1, 32], strides = [1, 1]} : vector<1x128xf32> to vector<1x32xf32>
    %236 = arith.negf %235 : vector<1x32xf32>
    %237 = math.exp %236 : vector<1x32xf32>
    %cst_70 = arith.constant 1.000000e+00 : f32
    %238 = vector.broadcast %cst_70 : f32 to vector<1x32xf32>
    %239 = arith.addf %238, %237 : vector<1x32xf32>
    %240 = arith.divf %238, %239 : vector<1x32xf32>
    %241 = arith.mulf %232, %214 : vector<1x32xf32>
    %242 = arith.mulf %226, %234 : vector<1x32xf32>
    %243 = arith.addf %241, %242 : vector<1x32xf32>
    %244 = math.tanh %243 : vector<1x32xf32>
    %245 = arith.mulf %240, %244 : vector<1x32xf32>
    %246 = vector.extract_strided_slice %40 {offsets = [7, 0], sizes = [1, 128], strides = [1, 1]} : vector<8x128xf32> to vector<1x128xf32>
    %c0_71 = arith.constant 0 : index
    %c0_72 = arith.constant 0 : index
    %247 = vector.load %arg7[%c0_71, %c0_72] : memref<32x128xf32, #tpu.memory_space<vmem>>, vector<32x128xf32>
    %cst_73 = arith.constant dense<0.000000e+00> : vector<1x128xf32>
    %248 = tpu.matmul %245, %247, %cst_73 {dimension_numbers = #tpu.dot_dimension_numbers<[1], [0], [0], [1], [0, 0, 1, 1], [], []>} : vector<1x32xf32>, vector<32x128xf32>, vector<1x128xf32> -> vector<1x128xf32>
    %249 = arith.addf %246, %248 : vector<1x128xf32>
    %250 = vector.extract_strided_slice %249 {offsets = [0, 0], sizes = [1, 32], strides = [1, 1]} : vector<1x128xf32> to vector<1x32xf32>
    %251 = arith.negf %250 : vector<1x32xf32>
    %252 = math.exp %251 : vector<1x32xf32>
    %cst_74 = arith.constant 1.000000e+00 : f32
    %253 = vector.broadcast %cst_74 : f32 to vector<1x32xf32>
    %254 = arith.addf %253, %252 : vector<1x32xf32>
    %255 = arith.divf %253, %254 : vector<1x32xf32>
    %256 = vector.extract_strided_slice %249 {offsets = [0, 32], sizes = [1, 32], strides = [1, 1]} : vector<1x128xf32> to vector<1x32xf32>
    %257 = arith.negf %256 : vector<1x32xf32>
    %258 = math.exp %257 : vector<1x32xf32>
    %cst_75 = arith.constant 1.000000e+00 : f32
    %259 = vector.broadcast %cst_75 : f32 to vector<1x32xf32>
    %260 = arith.addf %259, %258 : vector<1x32xf32>
    %261 = arith.divf %259, %260 : vector<1x32xf32>
    %262 = vector.extract_strided_slice %249 {offsets = [0, 64], sizes = [1, 32], strides = [1, 1]} : vector<1x128xf32> to vector<1x32xf32>
    %263 = math.tanh %262 : vector<1x32xf32>
    %264 = vector.extract_strided_slice %249 {offsets = [0, 96], sizes = [1, 32], strides = [1, 1]} : vector<1x128xf32> to vector<1x32xf32>
    %265 = arith.negf %264 : vector<1x32xf32>
    %266 = math.exp %265 : vector<1x32xf32>
    %cst_76 = arith.constant 1.000000e+00 : f32
    %267 = vector.broadcast %cst_76 : f32 to vector<1x32xf32>
    %268 = arith.addf %267, %266 : vector<1x32xf32>
    %269 = arith.divf %267, %268 : vector<1x32xf32>
    %270 = arith.mulf %261, %243 : vector<1x32xf32>
    %271 = arith.mulf %255, %263 : vector<1x32xf32>
    %272 = arith.addf %270, %271 : vector<1x32xf32>
    %273 = math.tanh %272 : vector<1x32xf32>
    %274 = arith.mulf %269, %273 : vector<1x32xf32>
    %275 = tpu.concatenate %71, %100, %129, %158, %187, %216, %245, %274 in 0 : vector<1x32xf32>, vector<1x32xf32>, vector<1x32xf32>, vector<1x32xf32>, vector<1x32xf32>, vector<1x32xf32>, vector<1x32xf32>, vector<1x32xf32> -> vector<8x32xf32>
    %c0_77 = arith.constant 0 : index
    %c0_78 = arith.constant 0 : index
    %276 = vector.load %arg14[%c0_77, %c0_78] : memref<8x32xf32, #tpu.memory_space<vmem>>, vector<8x32xf32>
    tpu.vector_store %arg14[%c0_77, %c0_78], %275 {strides = array<i32>} : memref<8x32xf32, #tpu.memory_space<vmem>>, vector<8x32xf32>,
    %c0_79 = arith.constant 0 : index
    %c0_80 = arith.constant 0 : index
    %277 = vector.load %arg9[%c0_79, %c0_80] : memref<32x16xf32, #tpu.memory_space<vmem>>, vector<32x16xf32>
    %cst_81 = arith.constant dense<0.000000e+00> : vector<8x16xf32>
    %278 = tpu.matmul %275, %277, %cst_81 {dimension_numbers = #tpu.dot_dimension_numbers<[1], [0], [0], [1], [0, 0, 1, 1], [], []>} : vector<8x32xf32>, vector<32x16xf32>, vector<8x16xf32> -> vector<8x16xf32>
    %c0_82 = arith.constant 0 : index
    %c0_83 = arith.constant 0 : index
    %279 = vector.load %arg10[%c0_82, %c0_83] : memref<1x16xf32, #tpu.memory_space<vmem>>, vector<1x16xf32>
    %280 = vector.broadcast %279 : vector<1x16xf32> to vector<8x16xf32>
    %281 = arith.addf %278, %280 : vector<8x16xf32>
    %cst_84 = arith.constant 0.000000e+00 : f32
    %282 = vector.broadcast %cst_84 : f32 to vector<8x16xf32>
    %283 = arith.maximumf %281, %282 : vector<8x16xf32>
    %c0_85 = arith.constant 0 : index
    %c0_86 = arith.constant 0 : index
    %284 = vector.load %arg11[%c0_85, %c0_86] : memref<16x2xf32, #tpu.memory_space<vmem>>, vector<16x2xf32>
    %cst_87 = arith.constant dense<0.000000e+00> : vector<8x2xf32>
    %285 = tpu.matmul %283, %284, %cst_87 {dimension_numbers = #tpu.dot_dimension_numbers<[1], [0], [0], [1], [0, 0, 1, 1], [], []>} : vector<8x16xf32>, vector<16x2xf32>, vector<8x2xf32> -> vector<8x2xf32>
    %c0_88 = arith.constant 0 : index
    %c0_89 = arith.constant 0 : index
    %286 = vector.load %arg12[%c0_88, %c0_89] : memref<1x2xf32, #tpu.memory_space<vmem>>, vector<1x2xf32>
    %287 = vector.broadcast %286 : vector<1x2xf32> to vector<8x2xf32>
    %288 = arith.addf %285, %287 : vector<8x2xf32>
    %c0_90 = arith.constant 0 : index
    %c0_91 = arith.constant 0 : index
    %289 = vector.load %arg13[%c0_90, %c0_91] : memref<8x2xf32, #tpu.memory_space<vmem>>, vector<8x2xf32>
    tpu.vector_store %arg13[%c0_90, %c0_91], %288 {strides = array<i32>} : memref<8x2xf32, #tpu.memory_space<vmem>>, vector<8x2xf32>,
    return
  }
}

</mosaic_0001>

<bundles_post_ra>
// kernel: tpu_custom_call.1
= control target key start
LH: loop header
LB: loop body
LE: loop exit
PB: predicated region body
PF: predicated region fallthrough
CT: control target
= control target key end

     0   :  { %20 = vsyncpa [#allocation3], 0  ;;  %s3977_s0 = inlined_call_operand.vmem [shape: f32[8,8,8], index: 0, kind: input, shape index: {}]   ;;  %s3978_s1 = inlined_call_operand.hbm [shape: f32[8,8,8], index: 1, kind: input, shape index: {}]   ;;  %s3979_s2 = inlined_call_operand.hbm [shape: f32[8,16], index: 2, kind: input, shape index: {}]   ;;  %s3980_s3 = inlined_call_operand.vmem [shape: f32[1,16], index: 3, kind: input, shape index: {}]   ;;  %s3981_s4 = inlined_call_operand.hbm [shape: f32[16,32], index: 4, kind: input, shape index: {}]   ;;  %s3982_s5 = inlined_call_operand.vmem [shape: f32[1,32], index: 5, kind: input, shape index: {}]   ;;  %s3983_s6 = inlined_call_operand.hbm [shape: f32[32,128], index: 6, kind: input, shape index: {}]   ;;  %s3984_s7 = inlined_call_operand.hbm [shape: f32[32,128], index: 7, kind: input, shape index: {}]   ;;  %s3985_s8 = inlined_call_operand.vmem [shape: f32[1,128], index: 8, kind: input, shape index: {}]   ;;  %s3986_s9 = inlined_call_operand.vmem [shape: f32[32,16], index: 9, kind: input, shape index: {}]   ;;  %s3987_s10 = inlined_call_operand.vmem [shape: f32[1,16], index: 10, kind: input, shape index: {}]   ;;  %s3988_s11 = inlined_call_operand.vmem [shape: f32[16,2], index: 11, kind: input, shape index: {}]   ;;  %s3989_s12 = inlined_call_operand.vmem [shape: f32[1,2], index: 12, kind: input, shape index: {}]   ;;  %s3990_s13 = inlined_call_operand.vmem [shape: f32[8,2], index: 13, kind: output, shape index: {0}]   ;;  %s3991_s14 = inlined_call_operand.hbm [shape: f32[8,32], index: 14, kind: output, shape index: {1}]  }
   0x1   :  { %21 = vsyncpa [#allocation6], 0 }
   0x2   :  { %22 = vsyncpa [#allocation9], 0 }
   0x3   :  { %23 = vsyncpa [#allocation4], 0  ;;  %s3505_s29 = smov [#allocation5]   ;;  %s3365_s17 = scalar_lea.hbm %s3979_s2, 128 }
   0x4   :  { %s44_s30 = sshll.u32 %s3505_s29, 4  ;;  %p3366_p0 = scmp.ne.s32.totalorder %s3979_s2, %s3365_s17  ;;  %s45_s30 = int_to_ptr.vmem [resolvable:$true] %s44_s30 }
   0x5   :  { %p3369_p1 = scmp.lt.u32.totalorder %s3365_s17, %s3979_s2 }
   0x7   :  { %p3371_p2 = pnand %p3369_p1, %p3366_p0 }
   0x9   :  { %3374 = shalt.err (!%p3371_p2)
}
   0xa   :  { %s3375_s22 = scalar_lea.vmem %s45_s30, 128  ;;  %p3380_p4 = scmp.lt.s32.totalorder %s45_s30, %s45_s30 }
   0xb   :  { %p3376_p3 = scmp.ne.s32.totalorder %s45_s30, %s3375_s22  ;;  %p3381_p5 = scmp.lt.s32.totalorder %s3375_s22, %s3375_s22 }
   0xd   :  { %p3382_p6 = por %p3381_p5, %p3380_p4 }
   0xf   :  { %p3383_p7 = pnand %p3382_p6, %p3376_p3 }
  0x11   :  { %3386 = shalt.err (!%p3383_p7)
}
  0x12   :  { %47 = dma.hbm_to_vmem [thread:$0]  %s3979_s2, 128, %s45_s30, [#allocation6]  }
  0x13   :  { %s3506_s25 = smov [#allocation8]   ;;  %s3507_s27 = smov [#allocation2]  }
  0x14   :  { %s69_s26 = sshll.u32 %s3506_s25, 4  ;;  %s31_s28 = sshll.u32 %s3507_s27, 4  ;;  %s70_s26 = int_to_ptr.vmem [resolvable:$true] %s69_s26  ;;  %s32_s28 = int_to_ptr.vmem [resolvable:$true] %s31_s28 }
  0x15   :  { %s3387_s16 = scalar_lea.hbm %s3983_s6, 512 }
  0x16   :  { %p3388_p8 = scmp.ne.s32.totalorder %s3983_s6, %s3387_s16  ;;  %p3391_p9 = scmp.lt.u32.totalorder %s3387_s16, %s3983_s6 }
  0x18   :  { %p3393_p10 = pnand %p3391_p9, %p3388_p8 }
  0x1a   :  { %3396 = shalt.err (!%p3393_p10)
}
  0x1b   :  { %s3397_s2 = scalar_lea.vmem %s70_s26, 512  ;;  %p3402_p12 = scmp.lt.s32.totalorder %s70_s26, %s70_s26 }
  0x1c   :  { %p3398_p11 = scmp.ne.s32.totalorder %s70_s26, %s3397_s2  ;;  %p3403_p13 = scmp.lt.s32.totalorder %s3397_s2, %s3397_s2 }
  0x1e   :  { %p3404_p0 = por %p3403_p13, %p3402_p12 }
  0x20   :  { %p3405_p1 = pnand %p3404_p0, %p3398_p11 }
  0x22   :  { %3408 = shalt.err (!%p3405_p1)
}
  0x23   :  { %s3508_s30 = smov 128   ;;  %s3509_s21 = smov 8  }
  0x24   :  { %75 = dma.hbm_to_vmem [thread:$0]  %s3983_s6, 512, %s70_s26, [#allocation9], %s3508_s30, %s3508_s30, %s3509_s21  }
  0x25   :  { %s3409_s27 = scalar_lea.hbm %s3978_s1, 1024 }
  0x26   :  { %p3410_p2 = scmp.ne.s32.totalorder %s3978_s1, %s3409_s27  ;;  %p3413_p3 = scmp.lt.u32.totalorder %s3409_s27, %s3978_s1 }
  0x28   :  { %p3415_p4 = pnand %p3413_p3, %p3410_p2 }
  0x2a   :  { %3418 = shalt.err (!%p3415_p4)
}
  0x2b   :  { %s3419_s18 = scalar_lea.vmem %s32_s28, 1024  ;;  %p3424_p6 = scmp.lt.s32.totalorder %s32_s28, %s32_s28 }
  0x2c   :  { %p3420_p5 = scmp.ne.s32.totalorder %s32_s28, %s3419_s18  ;;  %p3425_p7 = scmp.lt.s32.totalorder %s3419_s18, %s3419_s18 }
  0x2e   :  { %p3426_p8 = por %p3425_p7, %p3424_p6 }
  0x30   :  { %p3427_p9 = pnand %p3426_p8, %p3420_p5 }
  0x32   :  { %3430 = shalt.err (!%p3427_p9)
}
  0x33   :  { %37 = dma.hbm_to_vmem [thread:$0]  %s3978_s1, 1024, %s32_s28, [#allocation3], %s3508_s30, %s3508_s30, %s3509_s21  }
  0x34   :  { %s3510_s19 = smov [#allocation7]   ;;  %s3511_s2 = smov [#allocation10]  }
  0x35   :  { %s55_s20 = sshll.u32 %s3510_s19, 4  ;;  %s81_s22 = sshll.u32 %s3511_s2, 4  ;;  %s56_s20 = int_to_ptr.vmem [resolvable:$true] %s55_s20  ;;  %s82_s22 = int_to_ptr.vmem [resolvable:$true] %s81_s22 }
  0x36   :  { %s3431_s25 = scalar_lea.hbm %s3981_s4, 256 }
  0x37   :  { %p3432_p10 = scmp.ne.s32.totalorder %s3981_s4, %s3431_s25  ;;  %p3435_p11 = scmp.lt.u32.totalorder %s3431_s25, %s3981_s4 }
  0x39   :  { %p3437_p12 = pnand %p3435_p11, %p3432_p10 }
  0x3b   :  { %3440 = shalt.err (!%p3437_p12)
}
  0x3c   :  { %s3441_s1 = scalar_lea.vmem %s56_s20, 256  ;;  %p3446_p0 = scmp.lt.s32.totalorder %s56_s20, %s56_s20 }
  0x3d   :  { %p3442_p13 = scmp.ne.s32.totalorder %s56_s20, %s3441_s1  ;;  %p3447_p1 = scmp.lt.s32.totalorder %s3441_s1, %s3441_s1 }
  0x3f   :  { %p3448_p2 = por %p3447_p1, %p3446_p0 }
  0x41   :  { %p3449_p3 = pnand %p3448_p2, %p3442_p13 }
  0x43   :  { %3452 = shalt.err (!%p3449_p3)
}
  0x44   :  { %61 = dma.hbm_to_vmem [thread:$0]  %s3981_s4, 256, %s56_s20, [#allocation6], %s3508_s30, %s3508_s30, %s3509_s21  }
  0x45   :  { %s3453_s26 = scalar_lea.hbm %s3984_s7, 512 }
  0x46   :  { %p3454_p4 = scmp.ne.s32.totalorder %s3984_s7, %s3453_s26  ;;  %p3457_p5 = scmp.lt.u32.totalorder %s3453_s26, %s3984_s7 }
  0x48   :  { %p3459_p6 = pnand %p3457_p5, %p3454_p4 }
  0x4a   :  { %3462 = shalt.err (!%p3459_p6)
}
  0x4b   :  { %s3463_s25 = scalar_lea.vmem %s82_s22, 512  ;;  %p3468_p8 = scmp.lt.s32.totalorder %s82_s22, %s82_s22 }
  0x4c   :  { %p3464_p7 = scmp.ne.s32.totalorder %s82_s22, %s3463_s25  ;;  %p3469_p9 = scmp.lt.s32.totalorder %s3463_s25, %s3463_s25 }
  0x4e   :  { %p3470_p10 = por %p3469_p9, %p3468_p8 }
  0x50   :  { %p3471_p11 = pnand %p3470_p10, %p3464_p7 }
  0x52   :  { %3474 = shalt.err (!%p3471_p11)
}
  0x53   :  { %87 = dma.hbm_to_vmem [thread:$0]  %s3984_s7, 512, %s82_s22, [#allocation9], %s3508_s30, %s3508_s30, %s3509_s21  }
  0x54   :  { %3497 = dma.done.wait [#allocation3], 1024  }
  0x55   :  { %3498 = vsyncadd [#allocation3], 4294966272 }
  0x56   :  { %3499 = dma.done.wait [#allocation6], 384  }
  0x57   :  { %3500 = vsyncadd [#allocation6], 4294966912 }
  0x58   :  { %3501 = dma.done.wait [#allocation9], 1024  }
  0x59   :  { %3502 = vsyncadd [#allocation9], 4294966272  ;;  %v3512_v0 = vmov 0.0   ;;  %vm3513_vm0 = vmmov 0   ;;  %vm140_vm1 = vcmask 64512   ;;  %v121_v1 = vld [vmem:[#allocation2] sm:$0xff] }
  0x5a   :  { %2963 = vmatprep.subr.mxu0 %v3512_v0  ;;  %2968 = vmatprep.subr.mxu1 %v3512_v0  ;;  %v122_v2 = vld [vmem:[#allocation2 + $0x8] sm:$0xff]  ;;  %v3674_v3 = vld [vmem:[%s3977_s0] sm:$0xff]  ;;  %v123_v5 = vld [vmem:[#allocation2 + $0x10] sm:$0xff]  ;;  %vm1439_vm2 = vcmask 130048   ;;  %vm1577_vm6 = vcmask 523264   ;;  %vm1662_vm7 = vcmask 261120  }
  0x5b   :  { %2965 = vmatprep.mubr.msk.f32.mxu0 %vm3513_vm0, %v3512_v0  ;;  %2970 = vmatprep.mubr.msk.f32.mxu1 %vm3513_vm0, %v3512_v0  ;;  %v3679_v4 = vld [vmem:[%s3977_s0 + $0x8] sm:$0xff]  ;;  %v124_v6 = vld [vmem:[#allocation2 + $0x18] sm:$0xff]  ;;  %v3690_v7 = vld [vmem:[%s3977_s0 + $0x10] sm:$0xff]  ;;  %s3515_s4 = smov 64   ;;  %vm2586_vm8 = vcmask 1040384   ;;  %vm2588_vm9 = vcmask 1041408  }
  0x5c   :  { %2964 = vmatpush3.msra.mxu0 %v121_v1  ;;  %2969 = vmatpush3.msra.mxu1 %v122_v2  ;;  %v3695_v8 = vld [vmem:[%s3977_s0 + $0x18] sm:$0xff]  ;;  %v125_v9 = vld [vmem:[#allocation2 + $0x20] sm:$0xff]  ;;  %v126_v10 = vld [vmem:[#allocation2 + $0x28] sm:$0xff]  ;;  %vm2590_vm10 = vcmask 1042432   ;;  %vm2592_vm11 = vcmask 1043456   ;;  %vm2594_vm12 = vcmask 1044480  }
  0x5d   :  { %2966 = vmatmul.mubr.msk.f32.vlgmr.msra.gmra.mrb[0].mxu0 %vm140_vm1, %v3674_v3  ;;  %2971 = vmatmul.mubr.msk.f32.vlgmr.msra.gmra.mrb[0].mxu1 %vm140_vm1, %v3679_v4  ;;  %v3710_v11 = vld [vmem:[%s3977_s0 + $0x20] sm:$0xff]  ;;  %v3715_v12 = vld [vmem:[%s3977_s0 + $0x28] sm:$0xff]  ;;  %v127_v13 = vld [vmem:[#allocation2 + $0x30] sm:$0xff]  ;;  %vm2596_vm13 = vcmask 1045504   ;;  %vm2598_vm14 = vcmask 1046528   ;;  %s3517_s6 = smov [#allocation11]  }
  0x5e   :  { %2973 = vmatprep.subr.mxu0 %v3512_v0  ;;  %2978 = vmatprep.subr.mxu1 %v3512_v0  ;;  %v128_v14 = vld [vmem:[#allocation2 + $0x38] sm:$0xff]  ;;  %v3731_v15 = vld [vmem:[%s3977_s0 + $0x30] sm:$0xff]  ;;  %v725_v17 = vld [vmem:[#allocation5] sm:$0xff]  ;;  %s2781_s26 = sshll.u32 %s3517_s6, 4  ;;  %s2782_s26 = int_to_ptr.vmem [resolvable:$true] %s2781_s26 }
  0x5f   :  { %2974 = vmatpush3.msra.mxu0 %v123_v5  ;;  %2975 = vmatprep.mubr.msk.f32.mxu0 %vm3513_vm0, %v3512_v0  ;;  %v3736_v16 = vld [vmem:[%s3977_s0 + $0x38] sm:$0xff]  ;;  %v2802_v34 = vld [vmem:[%s3980_s3] ss:$0 sm:$0xff]  ;;  %v1430_v55 = vld [vmem:[#allocation7] sm:$0xff]  ;;  %s3475_s19 = scalar_lea.vmem %s2782_s26, 128  ;;  %p3480_p13 = scmp.lt.s32.totalorder %s2782_s26, %s2782_s26 }
  0x60   :  { %2979 = vmatpush3.msra.mxu1 %v124_v6  ;;  %2980 = vmatprep.mubr.msk.f32.mxu1 %vm3513_vm0, %v3512_v0  ;;  %v1431_v56 = vld [vmem:[#allocation7 + $0x8] sm:$0xff]  ;;  %p3476_p12 = scmp.ne.s32.totalorder %s2782_s26, %s3475_s19  ;;  %p3481_p0 = scmp.lt.s32.totalorder %s3475_s19, %s3475_s19 }
  0x61   :  { %2976 = vmatmul.mubr.msk.f32.vlgmr.msra.gmra.mrb[2].mxu0 %vm140_vm1, %v3690_v7  ;;  %2981 = vmatmul.mubr.msk.f32.vlgmr.msra.gmra.mrb[2].mxu1 %vm140_vm1, %v3695_v8  ;;  %v3209_v60 = vpack.c.bf16 %v1431_v56, %v1430_v55  ;;  %v1736_v56 = vld [vmem:[#allocation10] sm:$0xff] }
  0x62   :  { %2983 = vmatprep.subr.mxu0 %v3512_v0  ;;  %2988 = vmatprep.subr.mxu1 %v3512_v0  ;;  %p3482_p1 = por %p3481_p0, %p3480_p13 }
  0x63   :  { %2984 = vmatpush3.msra.mxu0 %v125_v9  ;;  %2985 = vmatprep.mubr.msk.f32.mxu0 %vm3513_vm0, %v3512_v0 }
  0x64   :  { %2989 = vmatpush3.msra.mxu1 %v126_v10  ;;  %2990 = vmatprep.mubr.msk.f32.mxu1 %vm3513_vm0, %v3512_v0  ;;  %p3483_p2 = pnand %p3482_p1, %p3476_p12 }
  0x65   :  { %2986 = vmatmul.mubr.msk.f32.vlgmr.msra.gmra.mrb[4].mxu0 %vm140_vm1, %v3710_v11  ;;  %2991 = vmatmul.mubr.msk.f32.vlgmr.msra.gmra.mrb[4].mxu1 %vm140_vm1, %v3715_v12 }
  0x66   :  { %2993 = vmatprep.subr.mxu0 %v3512_v0  ;;  %2995 = vmatprep.mubr.msk.f32.mxu0 %vm3513_vm0, %v3512_v0 }
  0x67   :  { %2994 = vmatpush3.msra.mxu0 %v127_v13  ;;  %2998 = vmatprep.subr.mxu1 %v3512_v0 }
  0x68   :  { %2999 = vmatpush3.msra.mxu1 %v128_v14  ;;  %3000 = vmatprep.mubr.msk.f32.mxu1 %vm3513_vm0, %v3512_v0 }
  0x69   :  { %2996 = vmatmul.mubr.msk.f32.vlgmr.msra.gmra.mrb[6].mxu0 %vm140_vm1, %v3731_v15  ;;  %3001 = vmatmul.mubr.msk.f32.vlgmr.msra.gmra.mrb[6].mxu1 %vm140_vm1, %v3736_v16 }
  0x6a   :  { %3017 = vmatprep.subr.mxu1 %v3512_v0  ;;  %3019 = vmatprep.mubr.msk.f32.mxu1 %vm3513_vm0, %v3512_v0 }
  0x6b   :  { %3003 = vmatprep.subr.mxu0 %v725_v17 }
  0x6c   :  { %3004 = vmatpush3.msra.mxu0 %v725_v17  ;;  %v1652_v17 = vld [vmem:[#allocation8 + $0x8] sm:$0xff] }
  0x6d   :  { %3037 = vmatprep.subr.mxu0 %v3512_v0 }
 0x130   :  { %v210_v18 = vpop.f32.mrb[0].mxu0  ;;  %v283_v19 = vpop.f32.mrb[0].mxu1 }
 0x131   :  { %v2967_v20 = vpop.f32.mrb[1].mxu0  ;;  %v2972_v21 = vpop.f32.mrb[1].mxu1  ;;  %3005 = vmatprep.mubr.msk.f32.mxu0 %vm140_vm1, %v210_v18 }
 0x132   :  { %3006 = vmatmul.mubr.msk.f32.vlgmr.msra.gmra.mrb[8].mxu0 %vm140_vm1, %v283_v19  ;;  %v1653_v19 = vld [vmem:[#allocation8 + $0x10] sm:$0xff]  ;;  %v1654_v20 = vld [vmem:[#allocation8 + $0x18] sm:$0xff] }
 0x133   :  { %v3229_v21 = vpack.c.bf16 %v1654_v20, %v1653_v19 }
 0x134   :  { %v356_v22 = vpop.f32.mrb[2].mxu0  ;;  %v429_v23 = vpop.f32.mrb[2].mxu1 }
 0x135   :  { %v2977_v24 = vpop.f32.mrb[3].mxu0  ;;  %v2982_v25 = vpop.f32.mrb[3].mxu1  ;;  %3008 = vmatprep.mubr.msk.f32.mxu0 %vm140_vm1, %v356_v22  ;;  %v2819_v22 = vld [vmem:[%s3982_s5] ss:$0 sm:$0xff] }
 0x136   :  { %3009 = vmatmul.mubr.msk.f32.gmra.mrb[10].mxu0 %vm140_vm1, %v429_v23 }
 0x138   :  { %v502_v26 = vpop.f32.mrb[4].mxu0  ;;  %v575_v27 = vpop.f32.mrb[4].mxu1 }
 0x139   :  { %v2987_v28 = vpop.f32.mrb[5].mxu0  ;;  %v2992_v29 = vpop.f32.mrb[5].mxu1  ;;  %3011 = vmatprep.mubr.msk.f32.mxu0 %vm140_vm1, %v502_v26 }
 0x13a   :  { %3012 = vmatmul.mubr.msk.f32.gmra.mrb[12].mxu0 %vm140_vm1, %v575_v27  ;;  %v129_v27 = vlaneseq }
 0x13c   :  { %v648_v30 = vpop.f32.mrb[6].mxu0  ;;  %v721_v31 = vpop.f32.mrb[6].mxu1 }
 0x13d   :  { %3014 = vmatprep.mubr.msk.f32.mxu0 %vm140_vm1, %v648_v30  ;;  %v2997_v32 = vpop.f32.mrb[7].mxu0  ;;  %v3002_v33 = vpop.f32.mrb[7].mxu1 }
 0x13e   :  { %3015 = vmatmul.mubr.msk.f32.gmra.mrb[14].mxu0 %vm140_vm1, %v721_v31  ;;  %v130_v31 = vshrl.u32 %v129_v27, 7 }
 0x13f   :  { %3039 = vmatprep.mubr.msk.f32.mxu0 %vm3513_vm0, %v3512_v0 }
 0x205   :  { %v3007_v35 = vpop.f32.mrb[8].mxu0 }
 0x206   :  { %v823_v36 = vpop.f32.mrb[9].mxu0  ;;  %v829_v37 = vadd.f32 %v3007_v35, %v2802_v34 }
 0x207   :  { %v824_v38 = vadd.f32 %v2802_v34, %v823_v36  ;;  %v135_v36 = vadd.s32 1, %v130_v31 }
 0x208   :  { %v863_v42 = vmax.f32 %v829_v37, 0.0 }
 0x209   :  { %v862_v39 = vmax.f32 %v824_v38, 0.0  ;;  %v3010_v40 = vpop.f32.mrb[10].mxu0 }
 0x20a   :  { %v833_v41 = vpop.f32.mrb[11].mxu0  ;;  %v839_v47 = vadd.f32 %v3010_v40, %v2802_v34 }
 0x20b   :  { %v834_v43 = vadd.f32 %v2802_v34, %v833_v41  ;;  %3018 = vmatpush3.msra.mxu1 %v862_v39 }
 0x20c   :  { %3020 = vmatmul.mubr.msk.f32.vlgmr.msra.gmra.mrb[8].mxu1 %vm140_vm1, %v3674_v3  ;;  %3022 = vmatprep.subr.mxu1 %v3512_v0  ;;  %v865_v53 = vmax.f32 %v839_v47, 0.0 }
 0x20d   :  { %v864_v44 = vmax.f32 %v834_v43, 0.0  ;;  %v3013_v45 = vpop.f32.mrb[12].mxu0  ;;  %3023 = vmatpush3.msra.mxu1 %v863_v42  ;;  %3024 = vmatprep.mubr.msk.f32.mxu1 %vm3513_vm0, %v3512_v0  ;;  %v132_v42 = vand.u32 127, %v129_v27 }
 0x20e   :  { %v843_v46 = vpop.f32.mrb[13].mxu0  ;;  %3027 = vmatprep.subr.mxu1 %v3512_v0  ;;  %v849_v49 = vadd.f32 %v3013_v45, %v2802_v34  ;;  %v133_v45 = vmul.u32 8, %v130_v31 }
 0x20f   :  { %v844_v48 = vadd.f32 %v2802_v34, %v843_v46  ;;  %v136_v46 = vmul.u32 8, %v135_v36 }
 0x210   :  { %3025 = vmatmul.mubr.msk.f32.vlgmr.msra.gmra.mrb[10].mxu1 %vm140_vm1, %v3679_v4  ;;  %v867_v57 = vmax.f32 %v849_v49, 0.0  ;;  %vm134_vm3 = vcmp.ge.s32.totalorder %v132_v42, %v133_v45 }
 0x211   :  { %v866_v50 = vmax.f32 %v844_v48, 0.0  ;;  %3028 = vmatpush3.msra.mxu1 %v864_v44  ;;  %3029 = vmatprep.mubr.msk.f32.mxu1 %vm3513_vm0, %v3512_v0  ;;  %v3016_v51 = vpop.f32.mrb[14].mxu0  ;;  %vm137_vm4 = vcmp.lt.s32.totalorder %v132_v42, %v136_v46 }
 0x212   :  { %3032 = vmatprep.subr.mxu1 %v3512_v0  ;;  %v853_v52 = vpop.f32.mrb[15].mxu0  ;;  %v859_v58 = vadd.f32 %v3016_v51, %v2802_v34  ;;  %vm138_vm5 = vmand %vm134_vm3, %vm137_vm4 }
 0x213   :  { %3038 = vmatpush3.msra.mxu0 %v866_v50  ;;  %v854_v54 = vadd.f32 %v2802_v34, %v853_v52 }
 0x214   :  { %3030 = vmatmul.mubr.msk.f32.vlgmr.msra.gmra.mrb[12].mxu1 %vm140_vm1, %v3690_v7  ;;  %3040 = vmatmul.mubr.msk.f32.vlgmr.msra.gmra.mrb[16].mxu0 %vm140_vm1, %v3710_v11  ;;  %v869_v61 = vmax.f32 %v859_v58, 0.0 }
 0x215   :  { %3033 = vmatpush3.msra.mxu1 %v865_v53  ;;  %3034 = vmatprep.mubr.msk.f32.mxu1 %vm3513_vm0, %v3512_v0  ;;  %v868_v59 = vmax.f32 %v854_v54, 0.0 }
 0x216   :  { %3042 = vmatprep.subr.mxu1 %v3512_v0  ;;  %3047 = vmatprep.subr.mxu0 %v3512_v0 }
 0x217   :  { %3048 = vmatpush3.msra.mxu0 %v868_v59  ;;  %3049 = vmatprep.mubr.msk.f32.mxu0 %vm3513_vm0, %v3512_v0  ;;  %v139_v59 = vsel %vm138_vm5, 0.125, %v3512_v0 }
 0x218   :  { %3035 = vmatmul.mubr.msk.f32.vlgmr.msra.gmra.mrb[14].mxu1 %vm140_vm1, %v3695_v8  ;;  %3050 = vmatmul.mubr.msk.f32.vlgmr.msra.gmra.mrb[18].mxu0 %vm140_vm1, %v3731_v15  ;;  %v3514_v15 = vmov 0.0|0.0  }
 0x219   :  { %3043 = vmatpush3.msra.mxu1 %v867_v57  ;;  %3044 = vmatprep.mubr.msk.f32.mxu1 %vm3513_vm0, %v3512_v0  ;;  %v1737_v57 = vld [vmem:[#allocation10 + $0x8] sm:$0xff] }
 0x21a   :  { %3052 = vmatprep.subr.mxu1 %v3512_v0  ;;  %3210 = vmatprep.subr.bf16.mxu0 %v3209_v60 }
 0x21b   :  { %3212 = vmatpush3.bf16.msra.mxu0 %v3209_v60  ;;  %v3819_v60 = vpack.c.bf16 %v1737_v57, %v1736_v56 }
 0x21c   :  { %3045 = vmatmul.mubr.msk.f32.vlgmr.msra.gmra.mrb[16].mxu1 %vm140_vm1, %v3715_v12  ;;  %3225 = vmatprep.subr.bf16.mxu0 %v3514_v15 }
 0x21d   :  { %3053 = vmatpush3.msra.mxu1 %v869_v61  ;;  %3054 = vmatprep.mubr.msk.f32.mxu1 %vm3513_vm0, %v3512_v0  ;;  %v1738_v61 = vld [vmem:[#allocation10 + $0x10] sm:$0xff] }
 0x21e   :  { %3213 = vmatprep.subr.bf16.mxu1 %v3514_v15 }
 0x220   :  { %3055 = vmatmul.mubr.msk.f32.vlgmr.msra.gmra.mrb[18].mxu1 %vm140_vm1, %v3736_v16  ;;  %v1651_v16 = vld [vmem:[#allocation8] sm:$0xff] }
 0x221   :  { %3089 = vmatprep.mubr.msk.f32.mxu1 %vm3513_vm0, %v3512_v0  ;;  %v3226_v18 = vpack.c.bf16 %v1652_v17, %v1651_v16 }
 0x2df   :  { %v936_v62 = vpop.f32.mrb[8].mxu1 }
 0x2e0   :  { %v3021_v63 = vpop.f32.mrb[9].mxu1  ;;  %3061 = vmatprep.mubr.msk.f32.mxu0 %vm1439_vm2, %v936_v62  ;;  %v1739_v62 = vld [vmem:[#allocation10 + $0x18] sm:$0xff] }
 0x2e1   :  { %v3826_v63 = vpack.c.bf16 %v1739_v62, %v1738_v61 }
 0x2e3   :  { %v1006_v1 = vpop.f32.mrb[10].mxu1 }
 0x2e4   :  { %v3026_v2 = vpop.f32.mrb[11].mxu1  ;;  %3062 = vmatmul.mubr.msk.f32.vlgmr.msra.gmra.mrb[20].mxu0 %vm1439_vm2, %v1006_v1 }
 0x2e5   :  { %3227 = vmatpush3.bf16.msra.mxu0 %v3226_v18 }
 0x2e6   :  { %3228 = vmatprep.subr.bf16.mxu0 %v3514_v15 }
 0x2e7   :  { %v1076_v3 = vpop.f32.mrb[12].mxu1  ;;  %v1216_v4 = vpop.f32.mrb[16].mxu0 }
 0x2e8   :  { %v3031_v5 = vpop.f32.mrb[13].mxu1  ;;  %3064 = vmatprep.mubr.msk.f32.mxu0 %vm1439_vm2, %v1076_v3  ;;  %v3041_v6 = vpop.f32.mrb[17].mxu0 }
 0x2e9   :  { %3230 = vmatpush3.bf16.msra.mxu0 %v3229_v21  ;;  %v2829_v5 = vld [vmem:[%s3985_s8] ss:$0 sm:$0xff]  ;;  %s3516_s8 = smov 32  }
 0x2ea   :  { %3237 = vmatprep.subr.bf16.mxu0 %v3514_v15 }
 0x2eb   :  { %v1146_v7 = vpop.f32.mrb[14].mxu1  ;;  %v1356_v8 = vpop.f32.mrb[18].mxu0 }
 0x2ec   :  { %3065 = vmatmul.mubr.msk.f32.gmra.mrb[22].mxu0 %vm1439_vm2, %v1146_v7  ;;  %v3036_v9 = vpop.f32.mrb[15].mxu1  ;;  %v3051_v10 = vpop.f32.mrb[19].mxu0 }
 0x2ed   :  { %3067 = vmatprep.mubr.msk.f32.mxu0 %vm1439_vm2, %v1216_v4 }
 0x2ef   :  { %v1286_v11 = vpop.f32.mrb[16].mxu1 }
 0x2f0   :  { %3068 = vmatmul.mubr.msk.f32.gmra.mrb[24].mxu0 %vm1439_vm2, %v1286_v11  ;;  %v3046_v12 = vpop.f32.mrb[17].mxu1 }
 0x2f1   :  { %3070 = vmatprep.mubr.msk.f32.mxu0 %vm1439_vm2, %v1356_v8 }
 0x2f3   :  { %v1426_v13 = vpop.f32.mrb[18].mxu1 }
 0x2f4   :  { %3071 = vmatmul.mubr.msk.f32.gmra.mrb[26].mxu0 %vm1439_vm2, %v1426_v13  ;;  %v3056_v14 = vpop.f32.mrb[19].mxu1 }
 0x2f5   :  { %3100 = vmatprep.mubr.msk.f32.mxu0 %vm3513_vm0, %v3512_v0 }
 0x3b7   :  { %v3063_v23 = vpop.f32.mrb[20].mxu0 }
 0x3b8   :  { %v1536_v24 = vadd.f32 %v3063_v23, %v2819_v22  ;;  %v1530_v25 = vpop.f32.mrb[21].mxu0 }
 0x3b9   :  { %v1531_v26 = vadd.f32 %v2819_v22, %v1530_v25 }
 0x3ba   :  { %v1570_v28 = vmax.f32 %v1536_v24, 0.0 }
 0x3bb   :  { %v1569_v29 = vmax.f32 %v1531_v26, 0.0 }
 0x3bd   :  { %v3214_v30 = vpack.c.bf16 %v1570_v28, %v1569_v29 }
 0x3bf   :  { %v3066_v32 = vpop.f32.mrb[22].mxu0  ;;  %3215 = vmatpush3.bf16.msra.mxu1 %v3214_v30 }
 0x3c0   :  { %v1546_v33 = vadd.f32 %v3066_v32, %v2819_v22  ;;  %v1540_v34 = vpop.f32.mrb[23].mxu0  ;;  %3216 = vmatprep.subr.bf16.mxu1 %v3514_v15 }
 0x3c1   :  { %v1541_v35 = vadd.f32 %v2819_v22, %v1540_v34 }
 0x3c2   :  { %v1572_v37 = vmax.f32 %v1546_v33, 0.0 }
 0x3c3   :  { %v1571_v38 = vmax.f32 %v1541_v35, 0.0  ;;  %v3069_v39 = vpop.f32.mrb[24].mxu0 }
 0x3c4   :  { %v1556_v40 = vadd.f32 %v3069_v39, %v2819_v22  ;;  %v1550_v41 = vpop.f32.mrb[25].mxu0 }
 0x3c5   :  { %v3217_v43 = vpack.c.bf16 %v1572_v37, %v1571_v38  ;;  %v1551_v44 = vadd.f32 %v2819_v22, %v1550_v41 }
 0x3c6   :  { %v1574_v47 = vmax.f32 %v1556_v40, 0.0 }
 0x3c7   :  { %v1573_v48 = vmax.f32 %v1551_v44, 0.0  ;;  %v3072_v49 = vpop.f32.mrb[26].mxu0  ;;  %3218 = vmatpush3.bf16.msra.mxu1 %v3217_v43 }
 0x3c8   :  { %v1566_v50 = vadd.f32 %v3072_v49, %v2819_v22  ;;  %v1560_v51 = vpop.f32.mrb[27].mxu0  ;;  %3219 = vmatprep.subr.bf16.mxu1 %v3514_v15 }
 0x3c9   :  { %v3220_v52 = vpack.c.bf16 %v1574_v47, %v1573_v48  ;;  %v1561_v53 = vadd.f32 %v2819_v22, %v1560_v51 }
 0x3ca   :  { %v1576_v54 = vmax.f32 %v1566_v50, 0.0 }
 0x3cb   :  { %v1575_v55 = vmax.f32 %v1561_v53, 0.0  ;;  %3221 = vmatpush3.bf16.msra.mxu1 %v3220_v52 }
 0x3cc   :  { %3222 = vmatprep.subr.bf16.mxu1 %v3514_v15 }
 0x3cd   :  { %v3223_v58 = vpack.c.bf16 %v1576_v54, %v1575_v55 }
 0x3cf   :  { %3224 = vmatpush3.bf16.msra.mxu1 %v3223_v58 }
 0x3d0   :  { %3231 = vmatprep.subr.bf16.mxu1 %v3514_v15 }
 0x3d2   :  { %3090 = vmatmul.mubr.msk.f32.vlgmr.msra.gmra.mrb[20].mxu1 %vm1577_vm6, %v139_v59 }
 0x3d3   :  { %3233 = vmatpush3.bf16.msra.mxu1 %v3819_v60  ;;  %3111 = vmatprep.mubr.msk.f32.mxu1 %vm3513_vm0, %v3512_v0 }
 0x3d4   :  { %3234 = vmatprep.subr.bf16.mxu1 %v3514_v15 }
 0x3d7   :  { %3236 = vmatpush3.bf16.msra.mxu1 %v3826_v63 }
 0x3d8   :  { %3243 = vmatprep.subr.bf16.mxu1 %v3514_v15 }
 0x3da   :  { %3112 = vmatmul.mubr.f32.vlgmr.msra.gmra.mrb[22].mxu1 %v3512_v0 }
 0x3db   :  { %3245 = vmatpush3.bf16.msra.mxu1 %v3819_v60  ;;  %3133 = vmatprep.mubr.msk.f32.mxu1 %vm3513_vm0, %v3512_v0 }
 0x3dc   :  { %3246 = vmatprep.subr.bf16.mxu1 %v3514_v15 }
 0x3df   :  { %3248 = vmatpush3.bf16.msra.mxu1 %v3826_v63 }
 0x3e0   :  { %3255 = vmatprep.subr.bf16.mxu1 %v3514_v15 }
 0x4a5   :  { %v1647_v1 = vpop.f32.mrb[20].mxu1 }
 0x4a6   :  { %3101 = vmatmul.mubr.msk.f32.vlgmr.msra.gmra.mrb[28].mxu0 %vm1662_vm7, %v1647_v1  ;;  %v3091_v2 = vpop.f32.mrb[21].mxu1 }
 0x4a7   :  { %3239 = vmatpush3.bf16.msra.mxu0 %v3819_v60  ;;  %3122 = vmatprep.mubr.msk.f32.mxu0 %vm3513_vm0, %v3512_v0 }
 0x4a8   :  { %3240 = vmatprep.subr.bf16.mxu0 %v3514_v15 }
 0x4ab   :  { %3242 = vmatpush3.bf16.msra.mxu0 %v3826_v63 }
 0x4ac   :  { %3249 = vmatprep.subr.bf16.mxu0 %v3514_v15 }
 0x4ad   :  { %v1809_v3 = vpop.f32.mrb[22].mxu1 }
 0x4ae   :  { %v3113_v4 = vpop.f32.mrb[23].mxu1 }
 0x579   :  { %v1732_v6 = vpop.f32.mrb[28].mxu0 }
 0x57a   :  { %v3847_v7 = vadd.f32 %v2829_v5, %v1732_v6  ;;  %v3102_v8 = vpop.f32.mrb[29].mxu0 }
 0x57c   :  { %v1813_v9 = vadd.f32 %v1809_v3, %v3847_v7 }
 0x57e   :  { %3301 = vtanh.f32 %v1813_v9  ;;  %v2831_v11 = vmul.f32 -1.442695, %v1813_v9 }
 0x580   :  { %3303 = vpow2.f32 %v2831_v11 }
 0x588   :  { %v3302_v10 = vpop.eup %3301 }
 0x589   :  { %1823 = vrot.lane.b32.xlu0 %v3302_v10, %s3515_s4 }
 0x58a   :  { %v3304_v12 = vpop.eup %3303 }
 0x58b   :  { %v1817_v13 = vadd.f32 1.0, %v3304_v12 }
 0x58d   :  { %3305 = vrcp.f32 %v1817_v13 }
 0x597   :  { %v3306_v14 = vpop.eup %3305 }
 0x598   :  { %v1821_v18 = vmul.f32 0.0, %v3306_v14 }
 0x5fb   :  { %v1824_v16 = vpop.permute.xlu0 %1823 }
 0x5fc   :  { %v1826_v17 = vmul.f32 %v3306_v14, %v1824_v16 }
 0x5fe   :  { %1828 = vrot.lane.b32.xlu0 %v1826_v17, %s3516_s8 }
 0x670   :  { %v1829_v19 = vpop.permute.xlu0 %1828 }
 0x671   :  { %v1831_v20 = vadd.f32 %v1829_v19, %v1821_v18 }
 0x673   :  { %3307 = vtanh.f32 %v1831_v20  ;;  %v1925_v36 = vrot.slane %v1831_v20, 7 }
 0x67d   :  { %v3308_v21 = vpop.eup %3307 }
 0x67e   :  { %1834 = vrot.lane.b32.xlu1 %v3308_v21, %s3515_s4 }
 0x6f0   :  { %v1835_v22 = vpop.permute.xlu1 %1834 }
 0x6f1   :  { %v3853_v23 = vmul.f32 %v3306_v14, %v1835_v22 }
 0x6f3   :  { %1839 = vrot.lane.b32.xlu1 %v3853_v23, %s3516_s8 }
 0x765   :  { %v1840_v24 = vpop.permute.xlu1 %1839 }
 0x766   :  { %3123 = vmatmul.mubr.msk.f32.vlgmr.msra.gmra.mrb[30].mxu0 %vm1662_vm7, %v1840_v24 }
 0x767   :  { %3251 = vmatpush3.bf16.msra.mxu0 %v3819_v60  ;;  %3144 = vmatprep.mubr.msk.f32.mxu0 %vm3513_vm0, %v3512_v0 }
 0x768   :  { %3252 = vmatprep.subr.bf16.mxu0 %v3514_v15 }
 0x76b   :  { %3254 = vmatpush3.bf16.msra.mxu0 %v3826_v63 }
 0x76c   :  { %3261 = vmatprep.subr.bf16.mxu0 %v3514_v15 }
 0x839   :  { %v1909_v25 = vpop.f32.mrb[30].mxu0 }
 0x83a   :  { %v1914_v26 = vrot.slane %v1909_v25, 7  ;;  %v3124_v27 = vpop.f32.mrb[31].mxu0 }
 0x83c   :  { %v1916_v28 = vadd.f32 %v1914_v26, %v3847_v7 }
 0x83e   :  { %3309 = vtanh.f32 %v1916_v28  ;;  %v2833_v30 = vmul.f32 -1.442695, %v1916_v28 }
 0x840   :  { %3311 = vpow2.f32 %v2833_v30 }
 0x848   :  { %v3310_v29 = vpop.eup %3309 }
 0x849   :  { %1929 = vrot.lane.b32.xlu0 %v3310_v29, %s3515_s4 }
 0x84a   :  { %v3312_v31 = vpop.eup %3311 }
 0x84b   :  { %v1920_v32 = vadd.f32 1.0, %v3312_v31 }
 0x84d   :  { %3313 = vrcp.f32 %v1920_v32 }
 0x857   :  { %v3314_v33 = vpop.eup %3313 }
 0x858   :  { %v1927_v37 = vmul.f32 %v3314_v33, %v1925_v36 }
 0x8bb   :  { %v1930_v34 = vpop.permute.xlu0 %1929 }
 0x8bc   :  { %v1932_v35 = vmul.f32 %v3314_v33, %v1930_v34 }
 0x8be   :  { %1934 = vrot.lane.b32.xlu1 %v1932_v35, %s3516_s8 }
 0x930   :  { %v1935_v38 = vpop.permute.xlu1 %1934 }
 0x931   :  { %v1937_v39 = vadd.f32 %v1935_v38, %v1927_v37 }
 0x933   :  { %3315 = vtanh.f32 %v1937_v39  ;;  %v2032_v56 = vrot.slane %v1937_v39, 7 }
 0x93d   :  { %v3316_v40 = vpop.eup %3315 }
 0x93e   :  { %1940 = vrot.lane.b32.xlu0 %v3316_v40, %s3515_s4 }
 0x9b0   :  { %v1941_v41 = vpop.permute.xlu0 %1940 }
 0x9b1   :  { %v1943_v42 = vmul.f32 %v3314_v33, %v1941_v41 }
 0x9b3   :  { %v1945_v43 = vrot.slane %v1943_v42, 1  ;;  %v2587_v2 = vsel %vm2586_vm8, %v3853_v23, %v1943_v42 }
 0x9b5   :  { %1946 = vrot.lane.b32.xlu1 %v1945_v43, %s3516_s8 }
 0xa27   :  { %v1947_v44 = vpop.permute.xlu1 %1946 }
 0xa28   :  { %3134 = vmatmul.mubr.msk.f32.vlgmr.msra.gmra.mrb[24].mxu1 %vm1662_vm7, %v1947_v44 }
 0xa29   :  { %3257 = vmatpush3.bf16.msra.mxu1 %v3819_v60  ;;  %3155 = vmatprep.mubr.msk.f32.mxu1 %vm3513_vm0, %v3512_v0 }
 0xa2a   :  { %3258 = vmatprep.subr.bf16.mxu1 %v3514_v15 }
 0xa2d   :  { %3260 = vmatpush3.bf16.msra.mxu1 %v3826_v63 }
 0xa2e   :  { %3267 = vmatprep.subr.bf16.mxu1 %v3514_v15 }
 0xafb   :  { %v2016_v45 = vpop.f32.mrb[24].mxu1 }
 0xafc   :  { %v2021_v46 = vrot.slane %v2016_v45, 6  ;;  %v3135_v47 = vpop.f32.mrb[25].mxu1 }
 0xafe   :  { %v2023_v48 = vadd.f32 %v2021_v46, %v3847_v7 }
 0xb00   :  { %3317 = vtanh.f32 %v2023_v48  ;;  %v2835_v50 = vmul.f32 -1.442695, %v2023_v48 }
 0xb02   :  { %3319 = vpow2.f32 %v2835_v50 }
 0xb0a   :  { %v3318_v49 = vpop.eup %3317 }
 0xb0b   :  { %2036 = vrot.lane.b32.xlu0 %v3318_v49, %s3515_s4 }
 0xb0c   :  { %v3320_v51 = vpop.eup %3319 }
 0xb0d   :  { %v2027_v52 = vadd.f32 1.0, %v3320_v51 }
 0xb0f   :  { %3321 = vrcp.f32 %v2027_v52 }
 0xb19   :  { %v3322_v53 = vpop.eup %3321 }
 0xb1a   :  { %v2034_v57 = vmul.f32 %v3322_v53, %v2032_v56 }
 0xb7d   :  { %v2037_v54 = vpop.permute.xlu0 %2036 }
 0xb7e   :  { %v2039_v55 = vmul.f32 %v3322_v53, %v2037_v54 }
 0xb80   :  { %2041 = vrot.lane.b32.xlu1 %v2039_v55, %s3516_s8 }
 0xbf2   :  { %v2042_v58 = vpop.permute.xlu1 %2041 }
 0xbf3   :  { %v2044_v59 = vadd.f32 %v2042_v58, %v2034_v57 }
 0xbf5   :  { %3323 = vtanh.f32 %v2044_v59  ;;  %v2139_v19 = vrot.slane %v2044_v59, 7 }
 0xbff   :  { %v3324_v61 = vpop.eup %3323 }
 0xc00   :  { %2047 = vrot.lane.b32.xlu0 %v3324_v61, %s3515_s4 }
 0xc72   :  { %v2048_v62 = vpop.permute.xlu0 %2047 }
 0xc73   :  { %v2050_v1 = vmul.f32 %v3322_v53, %v2048_v62 }
 0xc75   :  { %v2052_v3 = vrot.slane %v2050_v1, 2  ;;  %v2589_v4 = vsel %vm2588_vm9, %v2587_v2, %v2050_v1 }
 0xc77   :  { %2053 = vrot.lane.b32.xlu1 %v2052_v3, %s3516_s8 }
 0xce9   :  { %v2054_v5 = vpop.permute.xlu1 %2053 }
 0xcea   :  { %3145 = vmatmul.mubr.msk.f32.vlgmr.msra.gmra.mrb[32].mxu0 %vm1662_vm7, %v2054_v5 }
 0xceb   :  { %3263 = vmatpush3.bf16.msra.mxu0 %v3819_v60  ;;  %3166 = vmatprep.mubr.msk.f32.mxu0 %vm3513_vm0, %v3512_v0 }
 0xcec   :  { %3264 = vmatprep.subr.bf16.mxu0 %v3514_v15 }
 0xcef   :  { %3266 = vmatpush3.bf16.msra.mxu0 %v3826_v63 }
 0xcf0   :  { %3273 = vmatprep.subr.bf16.mxu0 %v3514_v15 }
 0xdbd   :  { %v2123_v6 = vpop.f32.mrb[32].mxu0 }
 0xdbe   :  { %v2128_v8 = vrot.slane %v2123_v6, 5  ;;  %v3146_v9 = vpop.f32.mrb[33].mxu0 }
 0xdc0   :  { %v2130_v10 = vadd.f32 %v2128_v8, %v3847_v7 }
 0xdc2   :  { %3325 = vtanh.f32 %v2130_v10  ;;  %v2837_v12 = vmul.f32 -1.442695, %v2130_v10 }
 0xdc4   :  { %3327 = vpow2.f32 %v2837_v12 }
 0xdcc   :  { %v3326_v11 = vpop.eup %3325 }
 0xdcd   :  { %2143 = vrot.lane.b32.xlu0 %v3326_v11, %s3515_s4 }
 0xdce   :  { %v3328_v13 = vpop.eup %3327 }
 0xdcf   :  { %v2134_v14 = vadd.f32 1.0, %v3328_v13 }
 0xdd1   :  { %3329 = vrcp.f32 %v2134_v14 }
 0xddb   :  { %v3330_v16 = vpop.eup %3329 }
 0xddc   :  { %v2141_v20 = vmul.f32 %v3330_v16, %v2139_v19 }
 0xe3f   :  { %v2144_v17 = vpop.permute.xlu0 %2143 }
 0xe40   :  { %v2146_v18 = vmul.f32 %v3330_v16, %v2144_v17 }
 0xe42   :  { %2148 = vrot.lane.b32.xlu1 %v2146_v18, %s3516_s8 }
 0xeb4   :  { %v2149_v21 = vpop.permute.xlu1 %2148 }
 0xeb5   :  { %v2151_v22 = vadd.f32 %v2149_v21, %v2141_v20 }
 0xeb7   :  { %3331 = vtanh.f32 %v2151_v22  ;;  %v2246_v40 = vrot.slane %v2151_v22, 7 }
 0xec1   :  { %v3332_v23 = vpop.eup %3331 }
 0xec2   :  { %2154 = vrot.lane.b32.xlu0 %v3332_v23, %s3515_s4 }
 0xf34   :  { %v2155_v24 = vpop.permute.xlu0 %2154 }
 0xf35   :  { %v2157_v25 = vmul.f32 %v3330_v16, %v2155_v24 }
 0xf37   :  { %v2159_v26 = vrot.slane %v2157_v25, 3  ;;  %v2591_v27 = vsel %vm2590_vm10, %v2589_v4, %v2157_v25 }
 0xf39   :  { %2160 = vrot.lane.b32.xlu1 %v2159_v26, %s3516_s8 }
 0xfab   :  { %v2161_v28 = vpop.permute.xlu1 %2160 }
 0xfac   :  { %3156 = vmatmul.mubr.msk.f32.vlgmr.msra.gmra.mrb[26].mxu1 %vm1662_vm7, %v2161_v28 }
 0xfad   :  { %3269 = vmatpush3.bf16.msra.mxu1 %v3819_v60  ;;  %3177 = vmatprep.mubr.msk.f32.mxu1 %vm3513_vm0, %v3512_v0 }
 0xfae   :  { %3270 = vmatprep.subr.bf16.mxu1 %v3514_v15 }
 0xfb1   :  { %3272 = vmatpush3.bf16.msra.mxu1 %v3826_v63 }
 0xfb2   :  { %3279 = vmatprep.subr.bf16.mxu1 %v3514_v15 }
0x107f   :  { %v2230_v29 = vpop.f32.mrb[26].mxu1 }
0x1080   :  { %v2235_v30 = vrot.slane %v2230_v29, 4  ;;  %v3157_v31 = vpop.f32.mrb[27].mxu1 }
0x1082   :  { %v2237_v32 = vadd.f32 %v2235_v30, %v3847_v7 }
0x1084   :  { %3333 = vtanh.f32 %v2237_v32  ;;  %v2839_v34 = vmul.f32 -1.442695, %v2237_v32 }
0x1086   :  { %3335 = vpow2.f32 %v2839_v34 }
0x108e   :  { %v3334_v33 = vpop.eup %3333 }
0x108f   :  { %2250 = vrot.lane.b32.xlu0 %v3334_v33, %s3515_s4 }
0x1090   :  { %v3336_v35 = vpop.eup %3335 }
0x1091   :  { %v2241_v36 = vadd.f32 1.0, %v3336_v35 }
0x1093   :  { %3337 = vrcp.f32 %v2241_v36 }
0x109d   :  { %v3338_v37 = vpop.eup %3337 }
0x109e   :  { %v2248_v41 = vmul.f32 %v3338_v37, %v2246_v40 }
0x1101   :  { %v2251_v38 = vpop.permute.xlu0 %2250 }
0x1102   :  { %v2253_v39 = vmul.f32 %v3338_v37, %v2251_v38 }
0x1104   :  { %2255 = vrot.lane.b32.xlu1 %v2253_v39, %s3516_s8 }
0x1176   :  { %v2256_v42 = vpop.permute.xlu1 %2255 }
0x1177   :  { %v2258_v43 = vadd.f32 %v2256_v42, %v2248_v41 }
0x1179   :  { %3339 = vtanh.f32 %v2258_v43 }
0x1183   :  { %v3340_v44 = vpop.eup %3339 }
0x1184   :  { %2261 = vrot.lane.b32.xlu0 %v3340_v44, %s3515_s4 }
0x11f6   :  { %v2262_v45 = vpop.permute.xlu0 %2261 }
0x11f7   :  { %v2264_v46 = vmul.f32 %v3338_v37, %v2262_v45  ;;  %v2606_v45 = vld [vmem:[%s3986_s9 + $0x8] sm:$0xff] }
0x11f9   :  { %v2266_v47 = vrot.slane %v2264_v46, 4  ;;  %v2593_v48 = vsel %vm2592_vm11, %v2591_v27, %v2264_v46  ;;  %v2607_v46 = vld [vmem:[%s3986_s9 + $0x10] sm:$0xff] }
0x11fb   :  { %2267 = vrot.lane.b32.xlu1 %v2266_v47, %s3516_s8 }
0x126d   :  { %v2268_v49 = vpop.permute.xlu1 %2267 }
0x126e   :  { %3167 = vmatmul.mubr.msk.f32.vlgmr.msra.gmra.mrb[34].mxu0 %vm1662_vm7, %v2268_v49 }
0x126f   :  { %3275 = vmatpush3.bf16.msra.mxu0 %v3819_v60  ;;  %3188 = vmatprep.mubr.msk.f32.mxu0 %vm3513_vm0, %v3512_v0 }
0x1270   :  { %3276 = vmatprep.subr.bf16.mxu0 %v3514_v15 }
0x1273   :  { %3278 = vmatpush3.bf16.msra.mxu0 %v3826_v63  ;;  %v2353_v63 = vrot.slane %v2258_v43, 7 }
0x1274   :  { %3285 = vmatprep.subr.bf16.mxu0 %v3514_v15 }
0x1341   :  { %v2337_v50 = vpop.f32.mrb[34].mxu0 }
0x1342   :  { %v2342_v51 = vrot.slane %v2337_v50, 3  ;;  %v3168_v52 = vpop.f32.mrb[35].mxu0 }
0x1344   :  { %v2344_v53 = vadd.f32 %v2342_v51, %v3847_v7 }
0x1346   :  { %3341 = vtanh.f32 %v2344_v53  ;;  %v2841_v55 = vmul.f32 -1.442695, %v2344_v53 }
0x1348   :  { %3343 = vpow2.f32 %v2841_v55  ;;  %v2689_v55 = vld [vmem:[%s3988_s11] sm:$0xff] }
0x1350   :  { %v3342_v54 = vpop.eup %3341 }
0x1351   :  { %2357 = vrot.lane.b32.xlu0 %v3342_v54, %s3515_s4 }
0x1352   :  { %v3344_v60 = vpop.eup %3343 }
0x1353   :  { %v2348_v56 = vadd.f32 1.0, %v3344_v60 }
0x1355   :  { %3345 = vrcp.f32 %v2348_v56  ;;  %v2846_v56 = vld [vmem:[%s3987_s10] ss:$0 sm:$0xff] }
0x135f   :  { %v3346_v57 = vpop.eup %3345 }
0x1360   :  { %v2355_v61 = vmul.f32 %v3346_v57, %v2353_v63 }
0x13c3   :  { %v2358_v58 = vpop.permute.xlu0 %2357 }
0x13c4   :  { %v2360_v59 = vmul.f32 %v3346_v57, %v2358_v58 }
0x13c6   :  { %2362 = vrot.lane.b32.xlu1 %v2360_v59, %s3516_s8 }
0x1438   :  { %v2363_v62 = vpop.permute.xlu1 %2362 }
0x1439   :  { %v2365_v1 = vadd.f32 %v2363_v62, %v2355_v61 }
0x143b   :  { %3347 = vtanh.f32 %v2365_v1  ;;  %v2460_v21 = vrot.slane %v2365_v1, 7 }
0x1445   :  { %v3348_v2 = vpop.eup %3347 }
0x1446   :  { %2368 = vrot.lane.b32.xlu0 %v3348_v2, %s3515_s4 }
0x14b8   :  { %v2369_v3 = vpop.permute.xlu0 %2368 }
0x14b9   :  { %v2371_v4 = vmul.f32 %v3346_v57, %v2369_v3 }
0x14bb   :  { %v2373_v5 = vrot.slane %v2371_v4, 5  ;;  %v2595_v6 = vsel %vm2594_vm12, %v2593_v48, %v2371_v4  ;;  %v2608_v48 = vld [vmem:[%s3986_s9 + $0x18] sm:$0xff] }
0x14bc   :  { %v3283_v49 = vpack.c.bf16 %v2608_v48, %v2607_v46 }
0x14bd   :  { %2374 = vrot.lane.b32.xlu1 %v2373_v5, %s3516_s8 }
0x152f   :  { %v2375_v8 = vpop.permute.xlu1 %2374 }
0x1530   :  { %3178 = vmatmul.mubr.msk.f32.vlgmr.msra.gmra.mrb[28].mxu1 %vm1662_vm7, %v2375_v8 }
0x1531   :  { %3199 = vmatprep.mubr.msk.f32.mxu1 %vm3513_vm0, %v3512_v0 }
0x1603   :  { %v2444_v9 = vpop.f32.mrb[28].mxu1 }
0x1604   :  { %v2449_v10 = vrot.slane %v2444_v9, 2  ;;  %v3179_v11 = vpop.f32.mrb[29].mxu1 }
0x1606   :  { %v2451_v12 = vadd.f32 %v2449_v10, %v3847_v7 }
0x1608   :  { %3349 = vtanh.f32 %v2451_v12  ;;  %v2843_v14 = vmul.f32 -1.442695, %v2451_v12 }
0x160a   :  { %3351 = vpow2.f32 %v2843_v14 }
0x1612   :  { %v3350_v13 = vpop.eup %3349 }
0x1613   :  { %2464 = vrot.lane.b32.xlu0 %v3350_v13, %s3515_s4 }
0x1614   :  { %v3352_v16 = vpop.eup %3351 }
0x1615   :  { %v2455_v17 = vadd.f32 1.0, %v3352_v16 }
0x1617   :  { %3353 = vrcp.f32 %v2455_v17 }
0x1621   :  { %v3354_v18 = vpop.eup %3353 }
0x1622   :  { %v2462_v22 = vmul.f32 %v3354_v18, %v2460_v21 }
0x1685   :  { %v2465_v19 = vpop.permute.xlu0 %2464 }
0x1686   :  { %v2467_v20 = vmul.f32 %v3354_v18, %v2465_v19 }
0x1688   :  { %2469 = vrot.lane.b32.xlu1 %v2467_v20, %s3516_s8 }
0x16fa   :  { %v2470_v23 = vpop.permute.xlu1 %2469 }
0x16fb   :  { %v2472_v24 = vadd.f32 %v2470_v23, %v2462_v22 }
0x16fd   :  { %3355 = vtanh.f32 %v2472_v24 }
0x1707   :  { %v3356_v25 = vpop.eup %3355 }
0x1708   :  { %2475 = vrot.lane.b32.xlu0 %v3356_v25, %s3515_s4 }
0x177a   :  { %v2476_v26 = vpop.permute.xlu0 %2475 }
0x177b   :  { %v2478_v27 = vmul.f32 %v3354_v18, %v2476_v26 }
0x177d   :  { %v2480_v28 = vrot.slane %v2478_v27, 6  ;;  %v2597_v29 = vsel %vm2596_vm13, %v2595_v6, %v2478_v27 }
0x177f   :  { %2481 = vrot.lane.b32.xlu1 %v2480_v28, %s3516_s8 }
0x17f1   :  { %v2482_v30 = vpop.permute.xlu1 %2481 }
0x17f2   :  { %3189 = vmatmul.mubr.msk.f32.vlgmr.msra.gmra.mrb[36].mxu0 %vm1662_vm7, %v2482_v30 }
0x17f3   :  { %3206 = vmatprep.mubr.msk.f32.mxu0 %vm3513_vm0, %v3512_v0  ;;  %v2567_v0 = vrot.slane %v2472_v24, 7 }
0x18c5   :  { %v2551_v31 = vpop.f32.mrb[36].mxu0 }
0x18c6   :  { %v2556_v32 = vrot.slane %v2551_v31, 1  ;;  %v3190_v33 = vpop.f32.mrb[37].mxu0 }
0x18c8   :  { %v2558_v34 = vadd.f32 %v2556_v32, %v3847_v7  ;;  %v2605_v7 = vld [vmem:[%s3986_s9] sm:$0xff] }
0x18c9   :  { %v3280_v47 = vpack.c.bf16 %v2606_v45, %v2605_v7 }
0x18ca   :  { %3357 = vtanh.f32 %v2558_v34  ;;  %v2845_v36 = vmul.f32 -1.442695, %v2558_v34 }
0x18cb   :  { %3281 = vmatpush3.bf16.msra.mxu1 %v3280_v47 }
0x18cc   :  { %3359 = vpow2.f32 %v2845_v36  ;;  %3282 = vmatprep.subr.bf16.mxu1 %v3514_v15  ;;  %v2690_v15 = vld [vmem:[%s3988_s11 + $0x8] sm:$0xff] }
0x18cd   :  { %v3286_v60 = vpack.c.bf16 %v2690_v15, %v2689_v55 }
0x18cf   :  { %3284 = vmatpush3.bf16.msra.mxu1 %v3283_v49  ;;  %3287 = vmatpush3.bf16.msra.mxu0 %v3286_v60 }
0x18d4   :  { %v3358_v35 = vpop.eup %3357 }
0x18d5   :  { %2571 = vrot.lane.b32.xlu0 %v3358_v35, %s3515_s4 }
0x18d6   :  { %v3360_v37 = vpop.eup %3359 }
0x18d7   :  { %v2562_v38 = vadd.f32 1.0, %v3360_v37 }
0x18d9   :  { %3361 = vrcp.f32 %v2562_v38 }
0x18e3   :  { %v3362_v39 = vpop.eup %3361 }
0x18e4   :  { %v2569_v42 = vmul.f32 %v3362_v39, %v2567_v0 }
0x1947   :  { %v2572_v40 = vpop.permute.xlu0 %2571 }
0x1948   :  { %v2574_v41 = vmul.f32 %v3362_v39, %v2572_v40 }
0x194a   :  { %2576 = vrot.lane.b32.xlu1 %v2574_v41, %s3516_s8 }
0x19bc   :  { %v2577_v43 = vpop.permute.xlu1 %2576 }
0x19bd   :  { %v2579_v44 = vadd.f32 %v2577_v43, %v2569_v42 }
0x19bf   :  { %3363 = vtanh.f32 %v2579_v44 }
0x19c9   :  { %v3364_v50 = vpop.eup %3363 }
0x19ca   :  { %2582 = vrot.lane.b32.xlu0 %v3364_v50, %s3515_s4 }
0x1a3c   :  { %v2583_v51 = vpop.permute.xlu0 %2582 }
0x1a3d   :  { %v2585_v52 = vmul.f32 %v3362_v39, %v2583_v51 }
0x1a3f   :  { %v2599_v53 = vsel %vm2598_vm14, %v2597_v29, %v2585_v52 }
0x1a40   :  { %2601 = vrot.lane.b32.xlu1 %v2599_v53, %s3516_s8 }
0x1ab2   :  { %v2602_v54 = vpop.permute.xlu1 %2601 }
0x1ab3   :  { %2604 = vst.msk [vmem:[#allocation11] sm:$0xff] %vm1662_vm7, %v2602_v54  ;;  %3200 = vmatmul.mubr.msk.f32.vlgmr.msra.gmra.mrb[30].mxu1 %vm1662_vm7, %v2602_v54 }
0x1b86   :  { %v2684_v57 = vpop.f32.mrb[30].mxu1 }
0x1b87   :  { %v2685_v58 = vadd.f32 %v2846_v56, %v2684_v57  ;;  %v3201_v59 = vpop.f32.mrb[31].mxu1 }
0x1b89   :  { %v2688_v63 = vmax.f32 %v2685_v58, 0.0 }
0x1b8b   :  { %3207 = vmatmul.mubr.msk.f32.vlgmr.msra.gmra.mrb[38].mxu0 %vm1439_vm2, %v2688_v63 }
0x1b8c   :  { %3486 = shalt.err (!%p3483_p2)
}
0x1b8d   :  { %s3487_s10 = scalar_lea.hbm %s3991_s14, 128 }
0x1b8e   :  { %p3488_p3 = scmp.ne.s32.totalorder %s3991_s14, %s3487_s10  ;;  %p3491_p4 = scmp.lt.u32.totalorder %s3487_s10, %s3991_s14 }
0x1b90   :  { %p3493_p5 = pnand %p3491_p4, %p3488_p3 }
0x1b92   :  { %3496 = shalt.err (!%p3493_p5)
}
0x1b93   :  { %2784 = dma.vmem_to_hbm [thread:$0]  %s2782_s26, 128, %s3991_s14, [#allocation4]   ;;  %v2848_v61 = vld [vmem:[%s3989_s12] ss:$0 sm:$0xff]  ;;  %vm2771_vm15 = vcmask 15360  }
0x1c5e   :  { %v2767_v62 = vpop.f32.mrb[38].mxu0 }
0x1c5f   :  { %v2768_v1 = vadd.f32 %v2848_v61, %v2767_v62  ;;  %v3208_v2 = vpop.f32.mrb[39].mxu0 }
0x1c61   :  { %2772 = vst.msk [vmem:[%s3990_s13] sm:$0xff] %vm2771_vm15, %v2768_v1 }
0x1c62   :  { %3503 = dma.done.wait [#allocation4], 128  }
0x1c63   :  { %3504 = vsyncadd [#allocation4], 4294967168 }
0x1c64   :  { %2790 = vsyncpa [#allocation3], 1 }
0x1c65   :  { %2791 = vsyncpa [#allocation6], 1 }
0x1c66   :  { %2792 = vsyncpa [#allocation9], 1 }
0x1c67   :  { %2793 = vsyncpa [#allocation4], 1 }

</bundles_post_ra>
